<compile_context>
chip_gen: v7x
topology: tpu7x:2x2x1
jax: 0.10.0
libtpu: 0.0.40
codegen_flags: <defaults>
</compile_context>

<pallas_src>
import jax
import jax.numpy as jnp
from jax.experimental import pallas as pl
from jax.experimental.pallas import tpu as pltpu


# ---------------------------------------------------------------------------
# Kernel
# ---------------------------------------------------------------------------
def _make_kernel(leak, ni, ei, eo):
    """Layout: features on sublanes, edges on lanes.

    x_ref    : (2*NI+EI, TE)  packed [source; target; edge_attr] (compute dtype)
    wbst_ref : (EO, NI*NI)    Wbst flattened, [o, i*NI+j] = W[o,i,j]
    wout_ref : (EO, EO*EI)    Wbee flattened, [o, p*EI+j] = W[o,p,j]
    b_ref    : (EO, 1)        bee bias (f32)
    o_ref    : (EO, TE)       output tile, lane-dense
    """
    n_bst = ni * ni
    n_bee = eo * ei

    def kernel(x_ref, wbst_ref, wout_ref, b_ref, o_ref):
        w_dt = wbst_ref.dtype
        te = o_ref.shape[1]

        s = x_ref[0:ni, :]                        # (NI, TE)
        t = x_ref[ni:2 * ni, :]                   # (NI, TE)
        ea = x_ref[2 * ni:, :]                    # (EI, TE)

        # ---- layer 1: z = bst(source, target) --------------------------------
        # Khatri-Rao rows built with sublane broadcasts (no MXU gather):
        #   p[i*NI + j, e] = s[i, e] * t[j, e]
        sa = jnp.broadcast_to(s[:, None, :], (ni, ni, te))
        tb = jnp.broadcast_to(t[None, :, :], (ni, ni, te))
        p = (sa * tb).reshape(n_bst, te)          # (NI*NI, TE), compute dtype
        z = jnp.dot(wbst_ref[...], p,
                    preferred_element_type=jnp.float32)      # (EO, TE) f32

        # ---- layer 2: z2 = bee(z, edge_attr) ---------------------------------
        # bee's "repeat z over j" expansion is folded into this broadcast:
        #   p2[o*EI + j, e] = z[o, e] * ea[j, e]
        zc = z.astype(w_dt)                       # only cast in the kernel (EOxTE)
        za = jnp.broadcast_to(zc[:, None, :], (eo, ei, te))
        eb = jnp.broadcast_to(ea[None, :, :], (eo, ei, te))
        p2 = (za * eb).reshape(n_bee, te)         # (EO*EI, TE)
        z2 = jnp.dot(wout_ref[...], p2,
                     preferred_element_type=jnp.float32) + b_ref[...]   # (EO, TE)

        # ---- LeakyReLU(leak) --------------------------------------------------
        o_ref[...] = jnp.where(z2 > 0, z2, leak * z2).astype(o_ref.dtype)

    return kernel


# ---------------------------------------------------------------------------
# Cacheable weight preprocessing
# ---------------------------------------------------------------------------
def prepare_bilin_params(params, *, compute_dtype=jnp.bfloat16):
    """Hoist the constant weight transposes/reshapes; call once, reuse per step."""
    w_bst, w_bee, b_bee = params["w_bst"], params["w_bee"], params["b_bee"]
    eo, ni, _ = w_bst.shape
    ei = w_bee.shape[2]
    # Wf[o, i*NI + j] = W[o, i, j] so each layer is one (EO, K) @ (K, TE) matmul.
    wbst_t = jnp.transpose(w_bst, (1, 2, 0)).reshape(ni * ni, eo).T
    wout = jnp.transpose(w_bee, (1, 2, 0)).reshape(eo * ei, eo).T
    return {
        "wbst_t": wbst_t.astype(compute_dtype),            # (EO, NI*NI)
        "wout": wout.astype(compute_dtype),                 # (EO, EO*EI)
        "b2": b_bee.reshape(eo, 1).astype(jnp.float32),     # (EO, 1)
    }


# ---------------------------------------------------------------------------
# Wrapper
# ---------------------------------------------------------------------------
def bilin_edge_model(source, target, edge_attr, params, leak, *,
                     tile_e=1024, compute_dtype=jnp.bfloat16,
                     out_dtype=jnp.float32, prepared=None):
    E, NI = source.shape
    EI = edge_attr.shape[1]
    EO = params["w_bst"].shape[0]
    F = 2 * NI + EI

    # Sublane alignment the in-kernel slices/reshapes rely on (8 f32 / 16 bf16).
    sub = 16 if compute_dtype == jnp.bfloat16 else 8
    assert NI % sub == 0 and EI % sub == 0 and EO % 8 == 0 and F % sub == 0, \
        "feature dims must be sublane-aligned"
    assert tile_e % 128 == 0, "tile_e must be a multiple of 128 lanes"
    # TODO(synk): pad odd feature dims if the module is ever built with non-multiple-of-8 sizes.

    if prepared is None:
        prepared = prepare_bilin_params(params, compute_dtype=compute_dtype)
    wbst_t = prepared["wbst_t"].astype(compute_dtype)
    wout = prepared["wout"].astype(compute_dtype)
    b2 = prepared["b2"].astype(jnp.float32)

    # ---- pack + pad + transpose edge tensors into the lane-dense layout -----
    num_tiles = pl.cdiv(E, tile_e)
    E_pad = num_tiles * tile_e
    # TODO(synk): for very large E, produce this (F, E) slab upstream to avoid
    # the extra XLA copy passes (concat/pad/transpose) over the edge tensors.
    x = jnp.concatenate([source, target, edge_attr], axis=1).astype(compute_dtype)
    x = jnp.pad(x, ((0, E_pad - E), (0, 0)))
    xt = x.T                                                  # (F, E_pad)

    out_t = pl.pallas_call(
        _make_kernel(float(leak), NI, EI, EO),
        out_shape=jax.ShapeDtypeStruct((EO, E_pad), out_dtype),
        grid_spec=pltpu.PrefetchScalarGridSpec(
            num_scalar_prefetch=0,
            grid=(num_tiles,),
            in_specs=[
                pl.BlockSpec((F, tile_e), lambda i: (0, i)),      # packed edges
                pl.BlockSpec(wbst_t.shape, lambda i: (0, 0)),     # bst projection
                pl.BlockSpec(wout.shape, lambda i: (0, 0)),       # bee projection
                pl.BlockSpec(b2.shape, lambda i: (0, 0)),         # bee bias
            ],
            out_specs=pl.BlockSpec((EO, tile_e), lambda i: (0, i)),
        ),
        compiler_params=pltpu.CompilerParams(
            # keep num_tiles >= 2 on v7x (2 TensorCores) to use the whole chip
            dimension_semantics=("parallel",),
            vmem_limit_bytes=32 * 1024 * 1024,
        ),
    )(xt, wbst_t, wout, b2)

    # (EO, E_pad) -> (E, EO); slicing drops the zero-padded tail edges.
    return out_t[:, :E].T


# ---------------------------------------------------------------------------
# Pure-JAX reference (for correctness check)
# ---------------------------------------------------------------------------
def bilin_edge_model_ref(source, target, edge_attr, params, leak):
    hi = jax.lax.Precision.HIGHEST
    z = jnp.einsum("ni,oij,nj->no", source, params["w_bst"], target, precision=hi)
    z = jnp.einsum("ni,oij,nj->no", z, params["w_bee"], edge_attr, precision=hi)
    z = z + params["b_bee"]
    return jnp.where(z > 0, z, leak * z)


# ---------------------------------------------------------------------------
if __name__ == "__main__":
    node_in, edge_in, edge_out = 16, 16, 16
    E = 2500            # deliberately NOT a multiple of tile_e (remainder path)
    leak = 0.1

    key = jax.random.PRNGKey(0)
    ks = jax.random.split(key, 10)

    # Module parameters (deterministic synthetic init, PyTorch Bilinear shapes).
    params = {
        # bse / bte exist in __init__, but forward() discards their outputs.
        "w_bse": jax.random.normal(ks[0], (edge_out, node_in, edge_in), jnp.float32) * 0.1,
        "b_bse": jax.random.normal(ks[1], (edge_out,), jnp.float32) * 0.1,
        "w_bte": jax.random.normal(ks[2], (edge_out, node_in, edge_in), jnp.float32) * 0.1,
        "b_bte": jax.random.normal(ks[3], (edge_out,), jnp.float32) * 0.1,
        "w_bst": jax.random.normal(ks[4], (edge_out, node_in, node_in), jnp.float32) * 0.1,
        "w_bee": jax.random.normal(ks[5], (edge_out, edge_out, edge_in), jnp.float32) * 0.1,
        "b_bee": jax.random.normal(ks[6], (edge_out,), jnp.float32) * 0.1,
    }

    source = jax.random.normal(ks[7], (E, node_in), jnp.float32)
    target = jax.random.normal(ks[8], (E, node_in), jnp.float32)
    edge_attr = jax.random.normal(ks[9], (E, edge_in), jnp.float32)
    # u / batch are accepted by forward() but unused; kept here only for parity.
    u = jnp.zeros((1, 4), jnp.float32)
    batch = jnp.zeros((E,), jnp.int32)

    ref = bilin_edge_model_ref(source, target, edge_attr, params, leak)

    # Default fast path: bf16 compute (f32 accumulation), tile_e=1024 ->
    # 3 parallel grid steps, remainder edges zero-padded and sliced off.
    out = bilin_edge_model(source, target, edge_attr, params, leak)
    out = jax.block_until_ready(out)
    assert out.shape == (E, edge_out)
    assert jnp.allclose(out, ref, atol=2e-1, rtol=1e-1), "bf16 kernel mismatch vs. reference"

    # f32 validation path at a different tile size (10-step parallel grid).
    out_f32 = bilin_edge_model(source, target, edge_attr, params, leak,
                               tile_e=256, compute_dtype=jnp.float32)
    out_f32 = jax.block_until_ready(out_f32)
    assert out_f32.shape == (E, edge_out)
    assert jnp.allclose(out_f32, ref, atol=1e-3, rtol=1e-3), "f32 kernel mismatch vs. reference"

    print("KERNEL_OK")
</pallas_src>

<mosaic_0001>
module attributes {stable_mosaic.version = 11 : i64} {
  func.func @kernel(%arg0: i32, %arg1: memref<48x1024xbf16, #tpu.memory_space<vmem>>, %arg2: memref<16x256xbf16, #tpu.memory_space<vmem>>, %arg3: memref<16x256xbf16, #tpu.memory_space<vmem>>, %arg4: memref<16x1xf32, #tpu.memory_space<vmem>>, %arg5: memref<16x1024xf32, #tpu.memory_space<vmem>>) attributes {dimension_semantics = [#tpu.dimension_semantics<parallel>], iteration_bounds = array<i64: 3>, scalar_prefetch = 0 : i64, scratch_operands = 0 : i64, tpu.core_type = #tpu.core_type<tc>, window_params = [{transform_indices = @transform_0, window_bounds = array<i64: 48, 1024>}, {pipeline_mode = #tpu.pipeline_mode<synchronous>, transform_indices = @transform_1, window_bounds = array<i64: 16, 256>}, {pipeline_mode = #tpu.pipeline_mode<synchronous>, transform_indices = @transform_2, window_bounds = array<i64: 16, 256>}, {pipeline_mode = #tpu.pipeline_mode<synchronous>, transform_indices = @transform_3, window_bounds = array<i64: 16, 1>}, {transform_indices = @transform_4, window_bounds = array<i64: 16, 1024>}]} {
    %c0 = arith.constant 0 : index
    %c0_0 = arith.constant 0 : index
    %0 = vector.load %arg1[%c0, %c0_0] : memref<48x1024xbf16, #tpu.memory_space<vmem>>, vector<16x1024xbf16>
    %c16 = arith.constant 16 : index
    %c0_1 = arith.constant 0 : index
    %1 = vector.load %arg1[%c16, %c0_1] : memref<48x1024xbf16, #tpu.memory_space<vmem>>, vector<16x1024xbf16>
    %c32 = arith.constant 32 : index
    %c0_2 = arith.constant 0 : index
    %2 = vector.load %arg1[%c32, %c0_2] : memref<48x1024xbf16, #tpu.memory_space<vmem>>, vector<16x1024xbf16>
    %3 = vector.shape_cast %0 : vector<16x1024xbf16> to vector<16x1x1024xbf16>
    %4 = vector.shape_cast %3 : vector<16x1x1024xbf16> to vector<16x1x1024xbf16>
    %5 = vector.broadcast %4 : vector<16x1x1024xbf16> to vector<16x16x1024xbf16>
    %6 = vector.shape_cast %1 : vector<16x1024xbf16> to vector<1x16x1024xbf16>
    %7 = vector.shape_cast %6 : vector<1x16x1024xbf16> to vector<1x16x1024xbf16>
    %8 = vector.broadcast %7 : vector<1x16x1024xbf16> to vector<16x16x1024xbf16>
    %9 = arith.mulf %5, %8 : vector<16x16x1024xbf16>
    %10 = vector.shape_cast %9 : vector<16x16x1024xbf16> to vector<256x1024xbf16>
    %c0_3 = arith.constant 0 : index
    %c0_4 = arith.constant 0 : index
    %11 = vector.load %arg2[%c0_3, %c0_4] : memref<16x256xbf16, #tpu.memory_space<vmem>>, vector<16x256xbf16>
    %cst = arith.constant dense<0.000000e+00> : vector<16x1024xf32>
    %12 = tpu.matmul %11, %10, %cst {dimension_numbers = #tpu.dot_dimension_numbers<[1], [0], [0], [1], [0, 0, 1, 1], [], []>} : vector<16x256xbf16>, vector<256x1024xbf16>, vector<16x1024xf32> -> vector<16x1024xf32>
    %13 = arith.truncf %12 : vector<16x1024xf32> to vector<16x1024xbf16>
    %14 = vector.shape_cast %13 : vector<16x1024xbf16> to vector<16x1x1024xbf16>
    %15 = vector.shape_cast %14 : vector<16x1x1024xbf16> to vector<16x1x1024xbf16>
    %16 = vector.broadcast %15 : vector<16x1x1024xbf16> to vector<16x16x1024xbf16>
    %17 = vector.shape_cast %2 : vector<16x1024xbf16> to vector<1x16x1024xbf16>
    %18 = vector.shape_cast %17 : vector<1x16x1024xbf16> to vector<1x16x1024xbf16>
    %19 = vector.broadcast %18 : vector<1x16x1024xbf16> to vector<16x16x1024xbf16>
    %20 = arith.mulf %16, %19 : vector<16x16x1024xbf16>
    %21 = vector.shape_cast %20 : vector<16x16x1024xbf16> to vector<256x1024xbf16>
    %c0_5 = arith.constant 0 : index
    %c0_6 = arith.constant 0 : index
    %22 = vector.load %arg3[%c0_5, %c0_6] : memref<16x256xbf16, #tpu.memory_space<vmem>>, vector<16x256xbf16>
    %cst_7 = arith.constant dense<0.000000e+00> : vector<16x1024xf32>
    %23 = tpu.matmul %22, %21, %cst_7 {dimension_numbers = #tpu.dot_dimension_numbers<[1], [0], [0], [1], [0, 0, 1, 1], [], []>} : vector<16x256xbf16>, vector<256x1024xbf16>, vector<16x1024xf32> -> vector<16x1024xf32>
    %c0_8 = arith.constant 0 : index
    %c0_9 = arith.constant 0 : index
    %24 = vector.load %arg4[%c0_8, %c0_9] : memref<16x1xf32, #tpu.memory_space<vmem>>, vector<16x1xf32>
    %25 = vector.broadcast %24 : vector<16x1xf32> to vector<16x1024xf32>
    %26 = arith.addf %23, %25 : vector<16x1024xf32>
    %cst_10 = arith.constant 0.000000e+00 : f32
    %27 = vector.broadcast %cst_10 : f32 to vector<16x1024xf32>
    %28 = arith.cmpf ogt, %26, %27 : vector<16x1024xf32>
    %cst_11 = arith.constant 1.000000e-01 : f32
    %29 = vector.broadcast %cst_11 : f32 to vector<16x1024xf32>
    %30 = arith.mulf %29, %26 : vector<16x1024xf32>
    %31 = arith.select %28, %26, %30 : vector<16x1024xi1>, vector<16x1024xf32>
    %c0_12 = arith.constant 0 : index
    %c0_13 = arith.constant 0 : index
    %32 = vector.load %arg5[%c0_12, %c0_13] : memref<16x1024xf32, #tpu.memory_space<vmem>>, vector<16x1024xf32>
    tpu.vector_store %arg5[%c0_12, %c0_13], %31 {strides = array<i32>} : memref<16x1024xf32, #tpu.memory_space<vmem>>, vector<16x1024xf32>,
    return
  }
  func.func @transform_0(%arg0: i32) -> (i32, i32) {
    %c0_i32 = arith.constant 0 : i32
    %c0_i32_0 = arith.constant 0 : i32
    return %c0_i32, %arg0 : i32, i32
  }
  func.func @transform_1(%arg0: i32) -> (i32, i32) {
    %c0_i32 = arith.constant 0 : i32
    %c0_i32_0 = arith.constant 0 : i32
    %c0_i32_1 = arith.constant 0 : i32
    return %c0_i32, %c0_i32_0 : i32, i32
  }
  func.func @transform_2(%arg0: i32) -> (i32, i32) {
    %c0_i32 = arith.constant 0 : i32
    %c0_i32_0 = arith.constant 0 : i32
    %c0_i32_1 = arith.constant 0 : i32
    return %c0_i32, %c0_i32_0 : i32, i32
  }
  func.func @transform_3(%arg0: i32) -> (i32, i32) {
    %c0_i32 = arith.constant 0 : i32
    %c0_i32_0 = arith.constant 0 : i32
    %c0_i32_1 = arith.constant 0 : i32
    return %c0_i32, %c0_i32_0 : i32, i32
  }
  func.func @transform_4(%arg0: i32) -> (i32, i32) {
    %c0_i32 = arith.constant 0 : i32
    %c0_i32_0 = arith.constant 0 : i32
    return %c0_i32, %arg0 : i32, i32
  }
}

</mosaic_0001>

<bundles_post_ra>
// kernel: tpu_custom_call.1
= control target key start
LH: loop header
LB: loop body
LE: loop exit
PB: predicated region body
PF: predicated region fallthrough
CT: control target
= control target key end

     0   :  { %9 = vsyncpa [#allocation3], 0  ;;  %s6135_s0 = inlined_call_operand.hbm [shape: bf16[48,3072], index: 0, kind: input, shape index: {}]   ;;  %s6136_s1 = inlined_call_operand.vmem [shape: bf16[16,256], index: 1, kind: input, shape index: {}]   ;;  %s6137_s2 = inlined_call_operand.hbm [shape: bf16[16,256], index: 2, kind: input, shape index: {}]   ;;  %s6138_s3 = inlined_call_operand.vmem [shape: f32[16,1], index: 3, kind: input, shape index: {}]   ;;  %s6139_s4 = inlined_call_operand.hbm [shape: f32[16,3072], index: 4, kind: output, shape index: {}]  }
   0x1   :  { %11 = vsyncpa [#allocation3 + $0x1], 0 }
   0x2   :  { %12 = vsyncpa [#allocation6], 0 }
   0x3   :  { %13 = vsyncpa [#allocation4], 0 }
   0x4   :  { %15 = vsyncpa [#allocation4 + $0x1], 0  ;;  %s4614_s15 = smov 0   ;;  %s4616_s16 = smov 0  }
   0x5   :  { %s4618_s17 = smov 0   ;;  %s4620_s18 = smov 0  }
   0x6 LB: > { %s4635_s19 = sadd.s32 4294967295, %s4574_s18   ;;  %s4302_s20 = sadd.s32 4294967294, %s4574_s18   ;;  %s4574_s18 = sphi %s4620_s18, %s6162_s18   ;;  %s4570_s17 = sphi %s4618_s17, %s6161_s17   ;;  %s4566_s16 = sphi %s4616_s16, %s6160_s16   ;;  %s4562_s15 = sphi %s4614_s15, %s6159_s15  }
   0x7   : > { %s4639_s21 = sadd.s32 1, %s4574_s18   ;;  %s28_s22 = sadd.s32 1, %s4570_s17 }
   0x8   : > { %s25_s23 = ssub.s32 %s4574_s18, %s4639_s21  ;;  %p35_p0 = scmp.ne.s32.totalorder %s4570_s17, %s4566_s16 }
   0x9   : > { %p26_p1 = scmp.eq.s32.totalorder %s25_s23, 0  ;;  %p36_p2 = scmp.eq.s32.totalorder %s4574_s18, 0 }
   0xa   : > { %p41_p3 = scmp.ne.s32.totalorder %s4566_s16, %s4562_s15  ;;  %p6140_p4 = scmp.eq.s32.totalorder %s4635_s19, 0 }
   0xb   : > { %s4651_s24 = scalar_select %p26_p1, %s4570_s17, %s28_s22  }
   0xc   : > { %p4653_p5 = por %p36_p2, %p35_p0  ;;  %p4659_p6 = por %p6140_p4, %p41_p3 }
   0xd   : > { %p128_p7 = scmp.eq.s32.totalorder %s4635_s19, 2  ;;  %p134_p8 = scmp.eq.s32.totalorder %s4302_s20, 2 }
   0xe   : > { %s6144_s25 = scalar_select %p4653_p5, 1, 0 }
   0xf   : > { %s6145_s26 = scalar_select %p4659_p6, 1, 0 }
  0x10   : > { %p4303_p9 = scmp.ge.s32.totalorder %s4574_s18, 1  ;;  %p141_p10 = scmp.lt.s32.totalorder %s4574_s18, 4 }
  0x11   : > { %p4666_p11 = por %p128_p7, %p35_p0  ;;  %p4670_p12 = por %p134_p8, %p41_p3 }
  0x12   : > { %p4674_p13 = pnand %p4303_p9, %p141_p10  ;;  %s4576_s30 = smov [#allocation5]  }
  0x13   : > { %s6146_s27 = scalar_select %p4666_p11, 1, 0 }
  0x14   : > { %s6147_s28 = scalar_select %p4670_p12, 1, 0 }
  0x15   : > { %s6148_s29 = scalar_select %p4674_p13, 1, 0 }
  0x16   : > { %p4380_p1 = pneg %p4674_p13  ;;  %s156_s5 = sshll.u32 %s4576_s30, 4  ;;  %s157_s5 = int_to_ptr.vmem [resolvable:$true] %s156_s5 }
  0x17   : > { %s173_s7 = sand.u32 1, %s4570_s17   ;;  %s4446_s10 = scalar_lea.hbm %s6137_s2, 256 }
  0x18   : > { %p4682_p2 = pnand %p4380_p1, %p6140_p4  ;;  %p4447_p3 = scmp.ne.s32.totalorder %s6137_s2, %s4446_s10 }
  0x19   : > { %p4453_p10 = scmp.lt.u32.totalorder %s4446_s10, %s6137_s2 }
  0x1a   : > { %p4448_p7 = pneg %p4682_p2 }
  0x1c   : > { %p4449_p8 = pnand %p4448_p7, %p4447_p3 }
  0x1e   : > { %p4450_p9 = pneg %p4449_p8 }
  0x20   : > { %p4455_p1 = pnand %p4453_p10, %p4450_p9 }
  0x22   : > { %4458 = shalt.err (!%p4455_p1)
}
  0x23   : > { %s4459_s20 = scalar_lea.vmem %s157_s5, 256  ;;  %p4467_p11 = scmp.lt.s32.totalorder %s157_s5, %s157_s5 }
  0x24   : > { %p4460_p4 = scmp.ne.s32.totalorder %s157_s5, %s4459_s20  ;;  %p4468_p6 = scmp.lt.s32.totalorder %s4459_s20, %s4459_s20 }
  0x26   : > { %p4462_p0 = pnand %p4460_p4, %p4448_p7  ;;  %p4469_p13 = por %p4468_p6, %p4467_p11 }
  0x28   : > { %p4463_p12 = pneg %p4462_p0 }
  0x2a   : > { %p4470_p5 = pnand %p4469_p13, %p4463_p12 }
  0x2c   : > { %4473 = shalt.err (!%p4470_p5)
}
  0x2d   : > { %s4577_s22 = smov 128   ;;  %s4578_s23 = smov 8  }
  0x2e   : > { %4383 = dma.hbm_to_vmem [thread:$0]  (!%p4682_p2), %s6137_s2, 256, %s157_s5, [#allocation6], %s4577_s22, %s4577_s22, %s4578_s23  }
  0x2f   : > { %p6150_p3 = scmp.ne.s32.totalorder %s6144_s25, 0  ;;  %p6151_p8 = scmp.lt.s32.totalorder %s4574_s18, 3 }
  0x30   : > { %s4370_s10 = smul.u32 192, %s173_s7  ;;  %s4368_s11 = sshll.u32 %s4574_s18, 9 }
  0x31   : > { %p4708_p4 = pnand %p6151_p8, %p6150_p3  ;;  %s4716_s14 = scalar_lea.hbm %s6135_s0, %s4368_s11 }
  0x32   : > { %s177_s5 = scalar_lea.vmem [#allocation2], %s4370_s10  ;;  %s4720_s6 = scalar_lea.sflag [#allocation3], %s173_s7 }
  0x33   : > { %s184_s25 = sshll.u32 %s177_s5, 4  ;;  %s4474_s20 = scalar_lea.hbm %s4716_s14, 3072  ;;  %s4718_s25 = int_to_ptr.vmem [resolvable:$true] %s184_s25 }
  0x34   : > { %p4475_p5 = scmp.ne.s32.totalorder %s4716_s14, %s4474_s20  ;;  %p4476_p6 = pneg %p4708_p4 }
  0x35   : > { %s4479_s30 = scalar_lea.hbm %s6135_s0, 9216  ;;  %p4480_p13 = scmp.lt.u32.totalorder %s4716_s14, %s6135_s0 }
  0x36   : > { %p4477_p11 = pnand %p4476_p6, %p4475_p5  ;;  %p4481_p2 = scmp.lt.u32.totalorder %s4479_s30, %s4474_s20 }
  0x37   : > { %p4483_p7 = scmp.lt.u32.totalorder %s4474_s20, %s4716_s14 }
  0x38   : > { %p4478_p12 = pneg %p4477_p11  ;;  %p4482_p0 = por %p4481_p2, %p4480_p13 }
  0x3a   : > { %p4484_p9 = por %p4483_p7, %p4482_p0 }
  0x3c   : > { %p4485_p10 = pnand %p4484_p9, %p4478_p12 }
  0x3e   : > { %4488 = shalt.err (!%p4485_p10)
}
  0x3f   : > { %s4489_s7 = scalar_lea.vmem %s4718_s25, 3072  ;;  %s4579_s10 = smov [#allocation2]  }
  0x40   : > { %p4490_p1 = scmp.ne.s32.totalorder %s4718_s25, %s4489_s7  ;;  %s4494_s12 = sshll.u32 %s4579_s10, 4  ;;  %s4495_s12 = int_to_ptr.vmem [resolvable:$false] %s4494_s12 }
  0x41   : > { %s4496_s13 = scalar_lea.vmem %s4495_s12, 6144  ;;  %p4497_p5 = scmp.lt.s32.totalorder %s4718_s25, %s4495_s12 }
  0x42   : > { %p4492_p3 = pnand %p4490_p1, %p4476_p6  ;;  %p4498_p11 = scmp.lt.s32.totalorder %s4496_s13, %s4489_s7 }
  0x44   : > { %p4493_p8 = pneg %p4492_p3  ;;  %p4499_p13 = por %p4498_p11, %p4497_p5 }
  0x46   : > { %p4500_p2 = pnand %p4499_p13, %p4493_p8 }
  0x48   : > { %4503 = shalt.err (!%p4500_p2)
}
  0x49   : > { %s4580_s5 = smov 1536   ;;  %s4581_s20 = smov 512  }
  0x4a   : > { %s4582_s22 = smov 32   ;;  %p6153_p6 = scmp.ne.s32.totalorder %s6148_s29, 0 }
  0x4b   : > { %4387 = dma.hbm_to_vmem [thread:$0]  (!%p4708_p4), %s4716_s14, 3072, %s4718_s25, %s4720_s6, %s4580_s5, %s4581_s20, %s4582_s22  }
  0x4c   : > { %196 = sbr.rel (%p6153_p6) target bundleno = 859 (0x35b), region = 36  ;;  %s4751_s23 = sand.u32 (!%p6153_p6), 1, %s4566_s16  }
  0x4d   : > { %s4371_s30 = smul.u32 (!%p6153_p6), 192, %s4751_s23  ;;  %s199_s8 = scalar_lea.sflag (!%p6153_p6), [#allocation3], %s4751_s23 }
  0x4e   : > { %p6154_p12 = scmp.ne.s32.totalorder (!%p6153_p6), %s6145_s26, 0 }
  0x4f   : > { %s4755_s11 = scalar_lea.vmem (!%p6153_p6), [#allocation2], %s4371_s30 }
  0x53   : > { %4549 = dma.done.wait (%p6154_p12), %s199_s8, 3072  }
  0x54   : > { %4551 = vsyncadd (%p6154_p12), %s199_s8, 4294964224  ;;  %p6155_p4 = scmp.eq.s32.totalorder %s4635_s19, 0 }
  0x56   : > { %4553 = dma.done.wait (%p6155_p4), [#allocation6], 256   ;;  %p6156_p0 = pmov %p6155_p4 }
  0x57   : > { %v300_v0 = vlaneseq  ;;  %v4583_v1 = vmov 1966171168   ;;  %v4311_v7 = vld.sshfl [vmem:[%s4755_s11] sm:$0xff pattern:$0x75316420]  ;;  %v242_v19 = vld [vmem:[%s4755_s11 + $0x48] sm:$0xff] }
  0x58   : > { %4555 = vsyncadd (%p6156_p0), [#allocation6], 4294967040  ;;  %v298_v2 = vunpack.c.l.s4 %v4583_v1  ;;  %v4312_v8 = vld.sshfl [vmem:[%s4755_s11 + $0x8] sm:$0xff pattern:$0x75316420]  ;;  %v241_v13 = vld [vmem:[%s4755_s11 + $0x40] sm:$0xff] }
  0x59   : > { %v4765_v3 = vshrl.u32 %v300_v0, 7  ;;  %v4313_v9 = vld.sshfl [vmem:[%s4755_s11 + $0x10] sm:$0xff pattern:$0x75316420]  ;;  %v293_v11 = vcombine.low %v4311_v7, %v4312_v8  ;;  %v294_v12 = vcombine.high %v4311_v7, %v4312_v8  ;;  %v245_v14 = vld [vmem:[%s4755_s11 + $0x60] sm:$0xff]  ;;  %v246_v22 = vld [vmem:[%s4755_s11 + $0x68] sm:$0xff] }
  0x5a   : > { %v299_v4 = vunpack.c.0.s8 %v298_v2  ;;  %v4314_v10 = vld.sshfl [vmem:[%s4755_s11 + $0x18] sm:$0xff pattern:$0x75316420]  ;;  %v4315_v24 = vld.sshfl [vmem:[%s4755_s11 + $0x20] sm:$0xff pattern:$0x75316420]  ;;  %v4799_v29 = vcombine.high %v241_v13, %v245_v14  ;;  %v4801_v30 = vcombine.low %v241_v13, %v245_v14  ;;  %v4817_v39 = vcombine.high %v242_v19, %v246_v22 }
  0x5b   : > { %v4771_v6 = vsub.s32 0, %v4765_v3  ;;  %v295_v15 = vcombine.low %v4313_v9, %v4314_v10  ;;  %v296_v16 = vcombine.high %v4313_v9, %v4314_v10  ;;  %v4780_v17 = vsub.s32 1, %v4765_v3  ;;  %v4316_v27 = vld.sshfl [vmem:[%s4755_s11 + $0x28] sm:$0xff pattern:$0x75316420]  ;;  %s4310_s12 = sshll.u32 %s4751_s23, 7 }
  0x5c   : > { %v4768_v5 = vsub.s32 %v299_v4, %v4765_v3  ;;  %v4783_v18 = vsub.s32 2, %v4765_v3  ;;  %v4788_v21 = vsub.s32 3, %v4765_v3  ;;  %v4797_v28 = vld.sshfl [vmem:[%s4755_s11 + $0x30] sm:$0xff pattern:$0x75316420]  ;;  %v357_v32 = vcombine.low %v4315_v24, %v4316_v27  ;;  %s6060_s13 = scalar_lea.vmem [#allocation7], %s4310_s12 }
  0x5d   : > { %v4804_v31 = vld.sshfl [vmem:[%s4755_s11 + $0x38] sm:$0xff pattern:$0x75316420]  ;;  %v358_v33 = vcombine.high %v4315_v24, %v4316_v27  ;;  %v4809_v34 = vld [vmem:[%s6136_s1 + $0x4] ss:$8 sps:$4 sm:$0xff]   ;;  %v4819_v40 = vcombine.low %v242_v19, %v246_v22  ;;  %s4369_s5 = sshll.u32 %s4635_s19, 10 }
  0x5e   : > { %v303_v20 = vrot.slane %v293_v11, %v4768_v5  ;;  %v310_v23 = vrot.slane %v294_v12, %v4768_v5  ;;  %v317_v25 = vrot.slane %v295_v15, %v4768_v5  ;;  %v324_v26 = vrot.slane %v296_v16, %v4768_v5  ;;  %2045 = vmatprep.mubr.bf16.mxu0 %v4809_v34  ;;  %s4219_s20 = sshll.u32 %s6060_s13, 4  ;;  %s6087_s30 = scalar_lea.hbm %s6139_s4, %s4369_s5  ;;  %s6089_s20 = int_to_ptr.vmem [resolvable:$true] %s4219_s20 }
  0x5f   : > { %v359_v41 = vcombine.low %v4797_v28, %v4804_v31  ;;  %v4824_v42 = vrot.slane %v357_v32, %v4768_v5  ;;  %v360_v46 = vcombine.high %v4797_v28, %v4804_v31  ;;  %2088 = vmatprep.mubr.bf16.mxu1 %v4809_v34  ;;  %v4846_v50 = vrot.slane %v358_v33, %v4768_v5  ;;  %s4206_s8 = scalar_lea.sflag [#allocation4], %s4751_s23  ;;  %p6157_p9 = scmp.ne.s32.totalorder %s6146_s27, 0 }
  0x60   : > { %v325_v35 = vcombine.low %v303_v20, %v317_v25  ;;  %v4811_v36 = vcombine.low %v310_v23, %v324_v26  ;;  %v4813_v37 = vcombine.high %v303_v20, %v317_v25  ;;  %v4815_v38 = vcombine.high %v310_v23, %v324_v26  ;;  %s4585_s26 = smov [#allocation7]  }
  0x61   : > { %s4508_s29 = sshll.u32 %s4585_s26, 4  ;;  %s4509_s29 = int_to_ptr.vmem [resolvable:$false] %s4508_s29 }
  0x62   : > { %v394_v43 = vunpack.i.h.s16 %v325_v35  ;;  %v4827_v44 = vpack.i.b16 %v325_v35, %v325_v35  ;;  %v4831_v45 = vpack.i.b16 %v4811_v36, %v4811_v36  ;;  %v396_v47 = vunpack.i.h.s16 %v4811_v36  ;;  %s4510_s9 = scalar_lea.vmem %s4509_s29, 4096  ;;  %p4511_p3 = scmp.lt.s32.totalorder %s6089_s20, %s4509_s29 }
  0x63   : > { %v4839_v48 = vpack.i.b16 %v4813_v37, %v4813_v37  ;;  %v4843_v49 = vpack.i.b16 %v4815_v38, %v4815_v38 }
  0x64   : > { %v432_v51 = vrot.slane %v4827_v44, %v4780_v17  ;;  %v440_v52 = vrot.slane %v4827_v44, %v4788_v21  ;;  %v428_v53 = vrot.slane %v4827_v44, %v4771_v6  ;;  %v436_v54 = vrot.slane %v4827_v44, %v4783_v18 }
  0x65   : > { %v4856_v55 = vpack.i.b16 %v394_v43, %v394_v43  ;;  %v496_v56 = vrot.slane %v4831_v45, %v4780_v17  ;;  %v504_v57 = vrot.slane %v4831_v45, %v4788_v21  ;;  %v492_v58 = vrot.slane %v4831_v45, %v4771_v6 }
  0x66   : > { %v945_v59 = vpack.i.b16 %v432_v51, %v432_v51  ;;  %v959_v60 = vpack.i.b16 %v440_v52, %v440_v52  ;;  %v938_v61 = vpack.i.b16 %v428_v53, %v428_v53  ;;  %v952_v62 = vpack.i.b16 %v436_v54, %v436_v54 }
  0x67   : > { %v464_v63 = vrot.slane %v4856_v55, %v4780_v17  ;;  %v472_v0 = vrot.slane %v4856_v55, %v4788_v21  ;;  %v460_v1 = vrot.slane %v4856_v55, %v4771_v6  ;;  %v468_v2 = vrot.slane %v4856_v55, %v4783_v18 }
  0x68   : > { %v950_v4 = vrot.slane %v945_v59, %v4771_v6  ;;  %v964_v7 = vrot.slane %v959_v60, %v4771_v6  ;;  %v943_v8 = vrot.slane %v938_v61, %v4771_v6  ;;  %v957_v9 = vrot.slane %v952_v62, %v4771_v6 }
  0x69   : > { %v1001_v10 = vpack.i.b16 %v464_v63, %v464_v63  ;;  %v1015_v11 = vpack.i.b16 %v472_v0, %v472_v0  ;;  %v994_v12 = vpack.i.b16 %v460_v1, %v460_v1  ;;  %v1008_v13 = vpack.i.b16 %v468_v2, %v468_v2 }
  0x6a   : > { %v1874_v14 = vmul.bf16 %v4799_v29, %v950_v4  ;;  %v1876_v15 = vmul.bf16 %v4817_v39, %v964_v7  ;;  %v1873_v16 = vmul.bf16 %v4801_v30, %v943_v8  ;;  %v1875_v19 = vmul.bf16 %v4819_v40, %v957_v9 }
  0x6b   : > { %v1006_v20 = vrot.slane %v1001_v10, %v4771_v6  ;;  %v1020_v22 = vrot.slane %v1015_v11, %v4771_v6  ;;  %v999_v23 = vrot.slane %v994_v12, %v4771_v6  ;;  %v1013_v24 = vrot.slane %v1008_v13, %v4771_v6 }
  0x6c   : > { %2013 = vmatprep.subr.bf16.mxu0 %v1874_v14  ;;  %2056 = vmatprep.subr.bf16.mxu1 %v1876_v15  ;;  %v1057_v25 = vpack.i.b16 %v496_v56, %v496_v56  ;;  %v1071_v26 = vpack.i.b16 %v504_v57, %v504_v57  ;;  %v1050_v27 = vpack.i.b16 %v492_v58, %v492_v58  ;;  %v398_v2 = vunpack.i.h.s16 %v4813_v37 }
  0x6d   : > { %2014 = vmatpush1.bf16.msra.mxu0 %v1873_v16  ;;  %2057 = vmatpush1.bf16.msra.mxu1 %v1875_v19  ;;  %v1882_v32 = vmul.bf16 %v4799_v29, %v1006_v20  ;;  %v1884_v33 = vmul.bf16 %v4817_v39, %v1020_v22  ;;  %v1881_v35 = vmul.bf16 %v4801_v30, %v999_v23 }
  0x6e   : > { %v1883_v36 = vmul.bf16 %v4819_v40, %v1013_v24  ;;  %v1062_v43 = vrot.slane %v1057_v25, %v4771_v6  ;;  %v1076_v51 = vrot.slane %v1071_v26, %v4771_v6  ;;  %v1055_v52 = vrot.slane %v1050_v27, %v4771_v6 }
  0x6f   : > { %2015 = vmatprep.subr.bf16.mxu0 %v1882_v32  ;;  %2058 = vmatprep.subr.bf16.mxu1 %v1884_v33  ;;  %v500_v53 = vrot.slane %v4831_v45, %v4783_v18  ;;  %v4893_v54 = vpack.i.b16 %v396_v47, %v396_v47  ;;  %v560_v56 = vrot.slane %v4839_v48, %v4780_v17 }
  0x70   : > { %v1890_v57 = vmul.bf16 %v4799_v29, %v1062_v43  ;;  %v1892_v58 = vmul.bf16 %v4817_v39, %v1076_v51  ;;  %v1889_v59 = vmul.bf16 %v4801_v30, %v1055_v52  ;;  %v568_v60 = vrot.slane %v4839_v48, %v4788_v21 }
  0x71   : > { %2016 = vmatpush1.bf16.msra.mxu0 %v1881_v35  ;;  %2059 = vmatpush1.bf16.msra.mxu1 %v1883_v36  ;;  %v1064_v61 = vpack.i.b16 %v500_v53, %v500_v53  ;;  %v528_v62 = vrot.slane %v4893_v54, %v4780_v17  ;;  %v536_v47 = vrot.slane %v4893_v54, %v4788_v21 }
  0x72   : > { %2017 = vmatprep.subr.bf16.mxu0 %v1890_v57  ;;  %2060 = vmatprep.subr.bf16.mxu1 %v1892_v58  ;;  %v524_v63 = vrot.slane %v4893_v54, %v4771_v6  ;;  %v532_v0 = vrot.slane %v4893_v54, %v4783_v18  ;;  %v1169_v1 = vpack.i.b16 %v560_v56, %v560_v56 }
  0x73   : > { %v1069_v4 = vrot.slane %v1064_v61, %v4771_v6  ;;  %v1113_v7 = vpack.i.b16 %v528_v62, %v528_v62  ;;  %v1127_v8 = vpack.i.b16 %v536_v47, %v536_v47  ;;  %v1183_v9 = vpack.i.b16 %v568_v60, %v568_v60 }
  0x74   : > { %v1106_v10 = vpack.i.b16 %v524_v63, %v524_v63  ;;  %v1120_v11 = vpack.i.b16 %v532_v0, %v532_v0  ;;  %v1174_v12 = vrot.slane %v1169_v1, %v4771_v6  ;;  %v556_v13 = vrot.slane %v4839_v48, %v4771_v6 }
  0x75   : > { %2018 = vmatpush1.bf16.msra.mxu0 %v1889_v59  ;;  %v1891_v14 = vmul.bf16 %v4819_v40, %v1069_v4  ;;  %v1118_v15 = vrot.slane %v1113_v7, %v4771_v6  ;;  %v1132_v16 = vrot.slane %v1127_v8, %v4771_v6  ;;  %v1188_v37 = vrot.slane %v1183_v9, %v4771_v6 }
  0x76   : > { %v1111_v19 = vrot.slane %v1106_v10, %v4771_v6  ;;  %v1125_v20 = vrot.slane %v1120_v11, %v4771_v6  ;;  %v1906_v22 = vmul.bf16 %v4799_v29, %v1174_v12  ;;  %v1162_v23 = vpack.i.b16 %v556_v13, %v556_v13 }
  0x77   : > { %2061 = vmatpush1.bf16.msra.mxu1 %v1891_v14  ;;  %v1898_v24 = vmul.bf16 %v4799_v29, %v1118_v15  ;;  %v1900_v25 = vmul.bf16 %v4817_v39, %v1132_v16  ;;  %v1908_v26 = vmul.bf16 %v4817_v39, %v1188_v37  ;;  %v564_v27 = vrot.slane %v4839_v48, %v4783_v18 }
  0x78   : > { %v1897_v32 = vmul.bf16 %v4801_v30, %v1111_v19  ;;  %v1899_v33 = vmul.bf16 %v4819_v40, %v1125_v20  ;;  %v1167_v35 = vrot.slane %v1162_v23, %v4771_v6  ;;  %v4930_v36 = vpack.i.b16 %v398_v2, %v398_v2 }
  0x79   : > { %2019 = vmatprep.subr.bf16.mxu0 %v1898_v24  ;;  %2062 = vmatprep.subr.bf16.mxu1 %v1900_v25  ;;  %v1176_v43 = vpack.i.b16 %v564_v27, %v564_v27  ;;  %v624_v51 = vrot.slane %v4843_v49, %v4780_v17  ;;  %v632_v52 = vrot.slane %v4843_v49, %v4788_v21  ;;  %v400_v62 = vunpack.i.h.s16 %v4815_v38 }
  0x7a   : > { %2020 = vmatpush1.bf16.msra.mxu0 %v1897_v32  ;;  %v1905_v53 = vmul.bf16 %v4801_v30, %v1167_v35  ;;  %v592_v56 = vrot.slane %v4930_v36, %v4780_v17  ;;  %v600_v57 = vrot.slane %v4930_v36, %v4788_v21  ;;  %v588_v58 = vrot.slane %v4930_v36, %v4771_v6 }
  0x7b   : > { %2063 = vmatpush1.bf16.msra.mxu1 %v1899_v33  ;;  %2021 = vmatprep.subr.bf16.mxu0 %v1906_v22  ;;  %v1181_v59 = vrot.slane %v1176_v43, %v4771_v6  ;;  %v596_v60 = vrot.slane %v4930_v36, %v4783_v18  ;;  %v1281_v61 = vpack.i.b16 %v624_v51, %v624_v51 }
  0x7c   : > { %2064 = vmatprep.subr.bf16.mxu1 %v1908_v26  ;;  %v1225_v47 = vpack.i.b16 %v592_v56, %v592_v56  ;;  %v1239_v63 = vpack.i.b16 %v600_v57, %v600_v57  ;;  %v1218_v0 = vpack.i.b16 %v588_v58, %v588_v58  ;;  %v1295_v1 = vpack.i.b16 %v632_v52, %v632_v52 }
  0x7d   : > { %v1907_v2 = vmul.bf16 %v4819_v40, %v1181_v59  ;;  %v1232_v4 = vpack.i.b16 %v596_v60, %v596_v60  ;;  %v1286_v7 = vrot.slane %v1281_v61, %v4771_v6  ;;  %v620_v8 = vrot.slane %v4843_v49, %v4771_v6 }
  0x7e   : > { %2022 = vmatpush1.bf16.msra.mxu0 %v1905_v53  ;;  %v1230_v9 = vrot.slane %v1225_v47, %v4771_v6  ;;  %v1244_v10 = vrot.slane %v1239_v63, %v4771_v6  ;;  %v1223_v38 = vrot.slane %v1218_v0, %v4771_v6  ;;  %v1300_v11 = vrot.slane %v1295_v1, %v4771_v6 }
  0x7f   : > { %2065 = vmatpush1.bf16.msra.mxu1 %v1907_v2  ;;  %v1237_v12 = vrot.slane %v1232_v4, %v4771_v6  ;;  %v1922_v13 = vmul.bf16 %v4799_v29, %v1286_v7  ;;  %v1274_v14 = vpack.i.b16 %v620_v8, %v620_v8  ;;  %v628_v15 = vrot.slane %v4843_v49, %v4783_v18 }
  0x80   : > { %v1914_v16 = vmul.bf16 %v4799_v29, %v1230_v9  ;;  %v1916_v37 = vmul.bf16 %v4817_v39, %v1244_v10  ;;  %v1913_v19 = vmul.bf16 %v4801_v30, %v1223_v38  ;;  %v1924_v20 = vmul.bf16 %v4817_v39, %v1300_v11 }
  0x81   : > { %v1915_v22 = vmul.bf16 %v4819_v40, %v1237_v12  ;;  %v1279_v23 = vrot.slane %v1274_v14, %v4771_v6  ;;  %v1288_v24 = vpack.i.b16 %v628_v15, %v628_v15  ;;  %v4965_v25 = vpack.i.b16 %v400_v62, %v400_v62 }
  0x82   : > { %v4968_v26 = vsub.s32 5, %v4765_v3  ;;  %2023 = vmatprep.subr.bf16.mxu0 %v1914_v16  ;;  %2066 = vmatprep.subr.bf16.mxu1 %v1916_v37  ;;  %v381_v27 = vrot.slane %v359_v41, %v4768_v5  ;;  %v4978_v32 = vrot.slane %v360_v46, %v4768_v5 }
  0x83   : > { %2024 = vmatpush1.bf16.msra.mxu0 %v1913_v19  ;;  %2067 = vmatpush1.bf16.msra.mxu1 %v1915_v22  ;;  %v1921_v33 = vmul.bf16 %v4801_v30, %v1279_v23  ;;  %v1293_v35 = vrot.slane %v1288_v24, %v4771_v6  ;;  %v656_v43 = vrot.slane %v4965_v25, %v4780_v17 }
  0x84   : > { %2025 = vmatprep.subr.bf16.mxu0 %v1922_v13  ;;  %2068 = vmatprep.subr.bf16.mxu1 %v1924_v20  ;;  %v664_v41 = vrot.slane %v4965_v25, %v4788_v21  ;;  %v652_v51 = vrot.slane %v4965_v25, %v4771_v6  ;;  %v660_v28 = vrot.slane %v4965_v25, %v4783_v18 }
  0x85   : > { %v1923_v31 = vmul.bf16 %v4819_v40, %v1293_v35  ;;  %v1337_v46 = vpack.i.b16 %v656_v43, %v656_v43  ;;  %v389_v52 = vcombine.low %v4824_v42, %v381_v27  ;;  %v4994_v53 = vcombine.low %v4846_v50, %v4978_v32 }
  0x86   : > { %v1351_v56 = vpack.i.b16 %v664_v41, %v664_v41  ;;  %v1330_v57 = vpack.i.b16 %v652_v51, %v652_v51  ;;  %v1344_v58 = vpack.i.b16 %v660_v28, %v660_v28  ;;  %v4998_v59 = vrot.slane %v4827_v44, %v4968_v26 }
  0x87   : > { %2026 = vmatpush1.bf16.msra.mxu0 %v1921_v33  ;;  %2069 = vmatpush1.bf16.msra.mxu1 %v1923_v31  ;;  %v1342_v60 = vrot.slane %v1337_v46, %v4771_v6  ;;  %v5001_v61 = vpack.i.b16 %v389_v52, %v389_v52  ;;  %v402_v62 = vunpack.i.h.s16 %v389_v52  ;;  %v5004_v47 = vcombine.high %v4824_v42, %v381_v27 }
  0x88   : > { %v1356_v63 = vrot.slane %v1351_v56, %v4771_v6  ;;  %v1335_v0 = vrot.slane %v1330_v57, %v4771_v6  ;;  %v1349_v1 = vrot.slane %v1344_v58, %v4771_v6  ;;  %v5011_v2 = vpack.i.b16 %v4994_v53, %v4994_v53 }
  0x89   : > { %v1930_v4 = vmul.bf16 %v4799_v29, %v1342_v60  ;;  %v688_v7 = vrot.slane %v5001_v61, %v4780_v17  ;;  %v696_v8 = vrot.slane %v5001_v61, %v4788_v21  ;;  %v684_v42 = vrot.slane %v5001_v61, %v4771_v6 }
  0x8a   : > { %v1932_v9 = vmul.bf16 %v4817_v39, %v1356_v63  ;;  %v1929_v10 = vmul.bf16 %v4801_v30, %v1335_v0  ;;  %v1931_v38 = vmul.bf16 %v4819_v40, %v1349_v1  ;;  %v692_v11 = vrot.slane %v5001_v61, %v4783_v18 }
  0x8b   : > { %2027 = vmatprep.subr.bf16.mxu0 %v1930_v4  ;;  %v1393_v12 = vpack.i.b16 %v688_v7, %v688_v7  ;;  %v1407_v13 = vpack.i.b16 %v696_v8, %v696_v8  ;;  %v1386_v14 = vpack.i.b16 %v684_v42, %v684_v42  ;;  %v5025_v15 = vpack.i.b16 %v402_v62, %v402_v62 }
  0x8c   : > { %2070 = vmatprep.subr.bf16.mxu1 %v1932_v9  ;;  %2028 = vmatpush1.bf16.msra.mxu0 %v1929_v10  ;;  %v1400_v16 = vpack.i.b16 %v692_v11, %v692_v11  ;;  %v752_v37 = vrot.slane %v5011_v2, %v4780_v17  ;;  %v760_v19 = vrot.slane %v5011_v2, %v4788_v21  ;;  %v404_v63 = vunpack.i.h.s16 %v4994_v53 }
  0x8d   : > { %2071 = vmatpush1.bf16.msra.mxu1 %v1931_v38  ;;  %v1398_v20 = vrot.slane %v1393_v12, %v4771_v6  ;;  %v1412_v22 = vrot.slane %v1407_v13, %v4771_v6  ;;  %v1391_v23 = vrot.slane %v1386_v14, %v4771_v6  ;;  %v720_v24 = vrot.slane %v5025_v15, %v4780_v17 }
  0x8e   : > { %v1405_v27 = vrot.slane %v1400_v16, %v4771_v6  ;;  %v728_v33 = vrot.slane %v5025_v15, %v4788_v21  ;;  %v716_v35 = vrot.slane %v5025_v15, %v4771_v6  ;;  %v724_v43 = vrot.slane %v5025_v15, %v4783_v18 }
  0x8f   : > { %v1938_v41 = vmul.bf16 %v4799_v29, %v1398_v20  ;;  %v1940_v51 = vmul.bf16 %v4817_v39, %v1412_v22  ;;  %v1937_v28 = vmul.bf16 %v4801_v30, %v1391_v23  ;;  %v1449_v31 = vpack.i.b16 %v720_v24, %v720_v24 }
  0x90   : > { %v1939_v46 = vmul.bf16 %v4819_v40, %v1405_v27  ;;  %v1463_v52 = vpack.i.b16 %v728_v33, %v728_v33  ;;  %v1442_v56 = vpack.i.b16 %v716_v35, %v716_v35  ;;  %v1456_v57 = vpack.i.b16 %v724_v43, %v724_v43 }
  0x91   : > { %2029 = vmatprep.subr.bf16.mxu0 %v1938_v41  ;;  %2072 = vmatprep.subr.bf16.mxu1 %v1940_v51  ;;  %v1454_v58 = vrot.slane %v1449_v31, %v4771_v6  ;;  %v1505_v60 = vpack.i.b16 %v752_v37, %v752_v37  ;;  %v1519_v62 = vpack.i.b16 %v760_v19, %v760_v19  ;;  %v406_v7 = vunpack.i.h.s16 %v5004_v47 }
  0x92   : > { %2030 = vmatpush1.bf16.msra.mxu0 %v1937_v28  ;;  %2073 = vmatpush1.bf16.msra.mxu1 %v1939_v46  ;;  %v1468_v0 = vrot.slane %v1463_v52, %v4771_v6  ;;  %v1447_v1 = vrot.slane %v1442_v56, %v4771_v6  ;;  %v1461_v4 = vrot.slane %v1456_v57, %v4771_v6 }
  0x93   : > { %v1946_v8 = vmul.bf16 %v4799_v29, %v1454_v58  ;;  %v1510_v42 = vrot.slane %v1505_v60, %v4771_v6  ;;  %v1524_v9 = vrot.slane %v1519_v62, %v4771_v6  ;;  %v748_v10 = vrot.slane %v5011_v2, %v4771_v6 }
  0x94   : > { %v1948_v53 = vmul.bf16 %v4817_v39, %v1468_v0  ;;  %v1945_v38 = vmul.bf16 %v4801_v30, %v1447_v1  ;;  %v1947_v11 = vmul.bf16 %v4819_v40, %v1461_v4  ;;  %v756_v12 = vrot.slane %v5011_v2, %v4783_v18 }
  0x95   : > { %2031 = vmatprep.subr.bf16.mxu0 %v1946_v8  ;;  %v1954_v13 = vmul.bf16 %v4799_v29, %v1510_v42  ;;  %v1956_v14 = vmul.bf16 %v4817_v39, %v1524_v9  ;;  %v1498_v16 = vpack.i.b16 %v748_v10, %v748_v10  ;;  %v5065_v37 = vpack.i.b16 %v404_v63, %v404_v63 }
  0x96   : > { %2074 = vmatprep.subr.bf16.mxu1 %v1948_v53  ;;  %2032 = vmatpush1.bf16.msra.mxu0 %v1945_v38  ;;  %v1512_v19 = vpack.i.b16 %v756_v12, %v756_v12  ;;  %v5069_v20 = vpack.i.b16 %v5004_v47, %v5004_v47  ;;  %v5071_v22 = vpack.i.b16 %v406_v7, %v406_v7 }
  0x97   : > { %2075 = vmatpush1.bf16.msra.mxu1 %v1947_v11  ;;  %2033 = vmatprep.subr.bf16.mxu0 %v1954_v13  ;;  %v1503_v23 = vrot.slane %v1498_v16, %v4771_v6  ;;  %v784_v24 = vrot.slane %v5065_v37, %v4780_v17  ;;  %v792_v27 = vrot.slane %v5065_v37, %v4788_v21 }
  0x98   : > { %2076 = vmatprep.subr.bf16.mxu1 %v1956_v14  ;;  %v1517_v33 = vrot.slane %v1512_v19, %v4771_v6  ;;  %v780_v35 = vrot.slane %v5065_v37, %v4771_v6  ;;  %v788_v47 = vrot.slane %v5065_v37, %v4783_v18  ;;  %v816_v43 = vrot.slane %v5069_v20, %v4780_v17 }
  0x99   : > { %v1953_v41 = vmul.bf16 %v4801_v30, %v1503_v23  ;;  %v1561_v51 = vpack.i.b16 %v784_v24, %v784_v24  ;;  %v1575_v28 = vpack.i.b16 %v792_v27, %v792_v27  ;;  %v824_v31 = vrot.slane %v5069_v20, %v4788_v21 }
  0x9a   : > { %v1955_v46 = vmul.bf16 %v4819_v40, %v1517_v33  ;;  %v1554_v52 = vpack.i.b16 %v780_v35, %v780_v35  ;;  %v1568_v56 = vpack.i.b16 %v788_v47, %v788_v47  ;;  %v1617_v57 = vpack.i.b16 %v816_v43, %v816_v43  ;;  %v243_v33 = vld [vmem:[%s4755_s11 + $0x50] sm:$0xff] }
  0x9b   : > { %2034 = vmatpush1.bf16.msra.mxu0 %v1953_v41  ;;  %v1566_v58 = vrot.slane %v1561_v51, %v4771_v6  ;;  %v1580_v60 = vrot.slane %v1575_v28, %v4771_v6  ;;  %v1631_v62 = vpack.i.b16 %v824_v31, %v824_v31  ;;  %v812_v63 = vrot.slane %v5069_v20, %v4771_v6  ;;  %v247_v35 = vld [vmem:[%s4755_s11 + $0x70] sm:$0xff] }
  0x9c   : > { %2077 = vmatpush1.bf16.msra.mxu1 %v1955_v46  ;;  %v1559_v0 = vrot.slane %v1554_v52, %v4771_v6  ;;  %v1573_v1 = vrot.slane %v1568_v56, %v4771_v6  ;;  %v1622_v4 = vrot.slane %v1617_v57, %v4771_v6  ;;  %v820_v7 = vrot.slane %v5069_v20, %v4783_v18 }
  0x9d   : > { %v1962_v8 = vmul.bf16 %v4799_v29, %v1566_v58  ;;  %v1964_v42 = vmul.bf16 %v4817_v39, %v1580_v60  ;;  %v1636_v9 = vrot.slane %v1631_v62, %v4771_v6  ;;  %v1610_v10 = vpack.i.b16 %v812_v63, %v812_v63 }
  0x9e   : > { %v1961_v53 = vmul.bf16 %v4801_v30, %v1559_v0  ;;  %v1963_v38 = vmul.bf16 %v4819_v40, %v1573_v1  ;;  %v1970_v11 = vmul.bf16 %v4799_v29, %v1622_v4  ;;  %v1624_v12 = vpack.i.b16 %v820_v7, %v820_v7 }
  0x9f   : > { %2035 = vmatprep.subr.bf16.mxu0 %v1962_v8  ;;  %2078 = vmatprep.subr.bf16.mxu1 %v1964_v42  ;;  %v1972_v13 = vmul.bf16 %v4817_v39, %v1636_v9  ;;  %v1615_v14 = vrot.slane %v1610_v10, %v4771_v6  ;;  %v848_v16 = vrot.slane %v5071_v22, %v4780_v17  ;;  %v5109_v19 = vsub.s32 4, %v4765_v3 }
  0xa0   : > { %2036 = vmatpush1.bf16.msra.mxu0 %v1961_v53  ;;  %2079 = vmatpush1.bf16.msra.mxu1 %v1963_v38  ;;  %v1629_v23 = vrot.slane %v1624_v12, %v4771_v6  ;;  %v856_v24 = vrot.slane %v5071_v22, %v4788_v21  ;;  %v844_v27 = vrot.slane %v5071_v22, %v4771_v6  ;;  %v5119_v47 = vsub.s32 6, %v4765_v3 }
  0xa1   : > { %2037 = vmatprep.subr.bf16.mxu0 %v1970_v11  ;;  %2080 = vmatprep.subr.bf16.mxu1 %v1972_v13  ;;  %v1969_v43 = vmul.bf16 %v4801_v30, %v1615_v14  ;;  %v1673_v41 = vpack.i.b16 %v848_v16, %v848_v16  ;;  %v852_v51 = vrot.slane %v5071_v22, %v4783_v18  ;;  %v5157_v12 = vsub.s32 7, %v4765_v3 }
  0xa2   : > { %v1971_v28 = vmul.bf16 %v4819_v40, %v1629_v23  ;;  %v1687_v31 = vpack.i.b16 %v856_v24, %v856_v24  ;;  %v1666_v46 = vpack.i.b16 %v844_v27, %v844_v27  ;;  %v392_v52 = vcombine.high %v4846_v50, %v4978_v32 }
  0xa3   : > { %v1678_v56 = vrot.slane %v1673_v41, %v4771_v6  ;;  %v1680_v57 = vpack.i.b16 %v852_v51, %v852_v51  ;;  %v973_v58 = vpack.i.b16 %v4998_v59, %v4998_v59  ;;  %v5130_v60 = vcombine.low %v243_v33, %v247_v35 }
  0xa4   : > { %2038 = vmatpush1.bf16.msra.mxu0 %v1969_v43  ;;  %2081 = vmatpush1.bf16.msra.mxu1 %v1971_v28  ;;  %v1692_v62 = vrot.slane %v1687_v31, %v4771_v6  ;;  %v1671_v63 = vrot.slane %v1666_v46, %v4771_v6  ;;  %v5134_v0 = vpack.i.b16 %v392_v52, %v392_v52  ;;  %v408_v1 = vunpack.i.h.s16 %v392_v52 }
  0xa5   : > { %v1978_v4 = vmul.bf16 %v4799_v29, %v1678_v56  ;;  %v1685_v50 = vrot.slane %v1680_v57, %v4771_v6  ;;  %v5139_v32 = vrot.slane %v973_v58, %v4771_v6  ;;  %v5141_v7 = vcombine.high %v243_v33, %v247_v35 }
  0xa6   : > { %v1980_v59 = vmul.bf16 %v4817_v39, %v1692_v62  ;;  %v1977_v8 = vmul.bf16 %v4801_v30, %v1671_v63  ;;  %v880_v42 = vrot.slane %v5134_v0, %v4780_v17  ;;  %v888_v9 = vrot.slane %v5134_v0, %v4788_v21  ;;  %v244_v62 = vld [vmem:[%s4755_s11 + $0x58] sm:$0xff] }
  0xa7   : > { %2039 = vmatprep.subr.bf16.mxu0 %v1978_v4  ;;  %v1979_v10 = vmul.bf16 %v4819_v40, %v1685_v50  ;;  %v876_v53 = vrot.slane %v5134_v0, %v4771_v6  ;;  %v884_v38 = vrot.slane %v5134_v0, %v4783_v18  ;;  %v5154_v11 = vpack.i.b16 %v408_v1, %v408_v1  ;;  %v248_v63 = vld [vmem:[%s4755_s11 + $0x78] sm:$0xff] }
  0xa8   : > { %2082 = vmatprep.subr.bf16.mxu1 %v1980_v59  ;;  %2040 = vmatpush1.bf16.msra.mxu0 %v1977_v8  ;;  %v1729_v13 = vpack.i.b16 %v880_v42, %v880_v42  ;;  %v1743_v14 = vpack.i.b16 %v888_v9, %v888_v9  ;;  %v1878_v16 = vmul.bf16 %v5141_v7, %v5139_v32 }
  0xa9   : > { %2083 = vmatpush1.bf16.msra.mxu1 %v1979_v10  ;;  %v1722_v23 = vpack.i.b16 %v876_v53, %v876_v53  ;;  %v1736_v24 = vpack.i.b16 %v884_v38, %v884_v38  ;;  %v912_v27 = vrot.slane %v5154_v11, %v4780_v17  ;;  %v920_v33 = vrot.slane %v5154_v11, %v4788_v21 }
  0xaa   : > { %v1734_v3 = vrot.slane %v1729_v13, %v4771_v6  ;;  %v1748_v35 = vrot.slane %v1743_v14, %v4771_v6  ;;  %v908_v43 = vrot.slane %v5154_v11, %v4771_v6  ;;  %v916_v41 = vrot.slane %v5154_v11, %v4783_v18 }
  0xab   : > { %v1727_v51 = vrot.slane %v1722_v23, %v4771_v6  ;;  %v1741_v28 = vrot.slane %v1736_v24, %v4771_v6  ;;  %v1785_v31 = vpack.i.b16 %v912_v27, %v912_v27  ;;  %v1799_v46 = vpack.i.b16 %v920_v33, %v920_v33 }
  0xac   : > { %v1986_v52 = vmul.bf16 %v4799_v29, %v1734_v3  ;;  %v1988_v56 = vmul.bf16 %v4817_v39, %v1748_v35  ;;  %v1778_v57 = vpack.i.b16 %v908_v43, %v908_v43  ;;  %v1792_v58 = vpack.i.b16 %v916_v41, %v916_v41 }
  0xad   : > { %v1985_v1 = vmul.bf16 %v4801_v30, %v1727_v51  ;;  %v1987_v4 = vmul.bf16 %v4819_v40, %v1741_v28  ;;  %v1790_v50 = vrot.slane %v1785_v31, %v4771_v6  ;;  %v1804_v32 = vrot.slane %v1799_v46, %v4771_v6 }
  0xae   : > { %2041 = vmatprep.subr.bf16.mxu0 %v1986_v52  ;;  %2084 = vmatprep.subr.bf16.mxu1 %v1988_v56  ;;  %v1783_v59 = vrot.slane %v1778_v57, %v4771_v6  ;;  %v1797_v8 = vrot.slane %v1792_v58, %v4771_v6  ;;  %v456_v42 = vrot.slane %v4827_v44, %v5157_v12 }
  0xaf   : > { %2042 = vmatpush1.bf16.msra.mxu0 %v1985_v1  ;;  %2085 = vmatpush1.bf16.msra.mxu1 %v1987_v4  ;;  %v1994_v9 = vmul.bf16 %v4799_v29, %v1790_v50  ;;  %v1996_v10 = vmul.bf16 %v4817_v39, %v1804_v32  ;;  %v5187_v53 = vcombine.low %v244_v62, %v248_v63 }
  0xb0   : > { %v1993_v38 = vmul.bf16 %v4801_v30, %v1783_v59  ;;  %v1995_v13 = vmul.bf16 %v4819_v40, %v1797_v8  ;;  %v987_v14 = vpack.i.b16 %v456_v42, %v456_v42  ;;  %v5191_v23 = vcombine.high %v244_v62, %v248_v63  ;;  %v5202_v30 = vld [vmem:[%s6136_s1] ss:$8 sps:$4 sm:$0xff]  }
  0xb1   : > { %2043 = vmatprep.subr.bf16.mxu0 %v1994_v9  ;;  %2086 = vmatprep.subr.bf16.mxu1 %v1996_v10  ;;  %v444_v24 = vrot.slane %v4827_v44, %v5109_v19  ;;  %v452_v27 = vrot.slane %v4827_v44, %v5119_v47  ;;  %v480_v29 = vrot.slane %v4856_v55, %v4968_v26 }
  0xb2   : > { %v992_v39 = vrot.slane %v987_v14, %v4771_v6  ;;  %v488_v40 = vrot.slane %v4856_v55, %v5157_v12  ;;  %v476_v33 = vrot.slane %v4856_v55, %v5109_v19  ;;  %v484_v3 = vrot.slane %v4856_v55, %v5119_v47 }
  0xb3   : > { %2044 = vmatpush1.bf16.msra.mxu0 %v1993_v38  ;;  %2087 = vmatpush1.bf16.msra.mxu1 %v1995_v13  ;;  %v966_v44 = vpack.i.b16 %v444_v24, %v444_v24  ;;  %v980_v35 = vpack.i.b16 %v452_v27, %v452_v27  ;;  %v1029_v43 = vpack.i.b16 %v480_v29, %v480_v29 }
  0xb4   : > { %2099 = vmatprep.subr.bf16.mxu0 %v1878_v16  ;;  %v1880_v41 = vmul.bf16 %v5191_v23, %v992_v39  ;;  %v1043_v51 = vpack.i.b16 %v488_v40, %v488_v40  ;;  %v1022_v28 = vpack.i.b16 %v476_v33, %v476_v33  ;;  %v1036_v31 = vpack.i.b16 %v484_v3, %v484_v3 }
  0xb5   : > { %v971_v46 = vrot.slane %v966_v44, %v4771_v6  ;;  %v985_v52 = vrot.slane %v980_v35, %v4771_v6  ;;  %v1034_v56 = vrot.slane %v1029_v43, %v4771_v6  ;;  %v512_v55 = vrot.slane %v4831_v45, %v4968_v26 }
  0xb6   : > { %2046 = vmatmul.mubr.bf16.vlgmr.msra.gmra.mrb[0].mxu0 %v5202_v30  ;;  %2089 = vmatmul.mubr.bf16.vlgmr.msra.gmra.mrb[0].mxu1 %v5202_v30  ;;  %v1048_v16 = vrot.slane %v1043_v51, %v4771_v6  ;;  %v1027_v57 = vrot.slane %v1022_v28, %v4771_v6  ;;  %v1041_v58 = vrot.slane %v1036_v31, %v4771_v6 }
  0xb7   : > { %2142 = vmatprep.subr.bf16.mxu1 %v1880_v41  ;;  %v1877_v62 = vmul.bf16 %v5130_v60, %v971_v46  ;;  %v1879_v63 = vmul.bf16 %v5187_v53, %v985_v52  ;;  %v1886_v1 = vmul.bf16 %v5141_v7, %v1034_v56  ;;  %v1085_v4 = vpack.i.b16 %v512_v55, %v512_v55 }
  0xb8   : > { %v1888_v50 = vmul.bf16 %v5191_v23, %v1048_v16  ;;  %v1885_v32 = vmul.bf16 %v5130_v60, %v1027_v57  ;;  %v1887_v59 = vmul.bf16 %v5187_v53, %v1041_v58  ;;  %v520_v8 = vrot.slane %v4831_v45, %v5157_v12  ;;  %2131 = vmatprep.mubr.bf16.mxu0 %v4809_v34 }
  0xb9   : > { %2100 = vmatpush1.bf16.msra.mxu0 %v1877_v62  ;;  %2143 = vmatpush1.bf16.msra.mxu1 %v1879_v63  ;;  %v1090_v42 = vrot.slane %v1085_v4, %v4771_v6  ;;  %v508_v9 = vrot.slane %v4831_v45, %v5109_v19  ;;  %v516_v10 = vrot.slane %v4831_v45, %v5119_v47 }
  0xba   : > { %2101 = vmatprep.subr.bf16.mxu0 %v1886_v1  ;;  %2144 = vmatprep.subr.bf16.mxu1 %v1888_v50  ;;  %v1099_v38 = vpack.i.b16 %v520_v8, %v520_v8  ;;  %v544_v13 = vrot.slane %v4893_v54, %v4968_v26  ;;  %v552_v14 = vrot.slane %v4893_v54, %v5157_v12 }
  0xbb   : > { %v1894_v24 = vmul.bf16 %v5141_v7, %v1090_v42  ;;  %v1078_v27 = vpack.i.b16 %v508_v9, %v508_v9  ;;  %v1092_v29 = vpack.i.b16 %v516_v10, %v516_v10  ;;  %v540_v39 = vrot.slane %v4893_v54, %v5109_v19  ;;  %2174 = vmatprep.mubr.bf16.mxu1 %v4809_v34 }
  0xbc   : > { %v1104_v45 = vrot.slane %v1099_v38, %v4771_v6  ;;  %v1141_v40 = vpack.i.b16 %v544_v13, %v544_v13  ;;  %v1155_v33 = vpack.i.b16 %v552_v14, %v552_v14  ;;  %v548_v3 = vrot.slane %v4893_v54, %v5119_v47 }
  0xbd   : > { %2102 = vmatpush1.bf16.msra.mxu0 %v1885_v32  ;;  %2145 = vmatpush1.bf16.msra.mxu1 %v1887_v59  ;;  %v1083_v44 = vrot.slane %v1078_v27, %v4771_v6  ;;  %v1097_v35 = vrot.slane %v1092_v29, %v4771_v6  ;;  %v1134_v43 = vpack.i.b16 %v540_v39, %v540_v39 }
  0xbe   : > { %2103 = vmatprep.subr.bf16.mxu0 %v1894_v24  ;;  %v1896_v41 = vmul.bf16 %v5191_v23, %v1104_v45  ;;  %v1146_v51 = vrot.slane %v1141_v40, %v4771_v6  ;;  %v1160_v34 = vrot.slane %v1155_v33, %v4771_v6  ;;  %v1148_v28 = vpack.i.b16 %v548_v3, %v548_v3 }
  0xbf   : > { %v1893_v31 = vmul.bf16 %v5130_v60, %v1083_v44  ;;  %v1895_v46 = vmul.bf16 %v5187_v53, %v1097_v35  ;;  %v1139_v54 = vrot.slane %v1134_v43, %v4771_v6  ;;  %v576_v52 = vrot.slane %v4839_v48, %v4968_v26 }
  0xc0   : > { %2146 = vmatprep.subr.bf16.mxu1 %v1896_v41  ;;  %v1902_v56 = vmul.bf16 %v5141_v7, %v1146_v51  ;;  %v1904_v55 = vmul.bf16 %v5191_v23, %v1160_v34  ;;  %v1153_v16 = vrot.slane %v1148_v28, %v4771_v6  ;;  %v584_v57 = vrot.slane %v4839_v48, %v5157_v12 }
  0xc1   : > { %2104 = vmatpush1.bf16.msra.mxu0 %v1893_v31  ;;  %2147 = vmatpush1.bf16.msra.mxu1 %v1895_v46  ;;  %v1901_v58 = vmul.bf16 %v5130_v60, %v1139_v54  ;;  %v1197_v62 = vpack.i.b16 %v576_v52, %v576_v52  ;;  %v572_v63 = vrot.slane %v4839_v48, %v5109_v19 }
  0xc2   : > { %2105 = vmatprep.subr.bf16.mxu0 %v1902_v56  ;;  %2148 = vmatprep.subr.bf16.mxu1 %v1904_v55  ;;  %v1903_v1 = vmul.bf16 %v5187_v53, %v1153_v16  ;;  %v1211_v4 = vpack.i.b16 %v584_v57, %v584_v57  ;;  %v580_v50 = vrot.slane %v4839_v48, %v5119_v47 }
  0xc3   : > { %v1202_v32 = vrot.slane %v1197_v62, %v4771_v6  ;;  %v1190_v59 = vpack.i.b16 %v572_v63, %v572_v63  ;;  %v608_v8 = vrot.slane %v4930_v36, %v4968_v26  ;;  %v616_v42 = vrot.slane %v4930_v36, %v5157_v12 }
  0xc4   : > { %v1216_v9 = vrot.slane %v1211_v4, %v4771_v6  ;;  %v1204_v10 = vpack.i.b16 %v580_v50, %v580_v50  ;;  %v604_v38 = vrot.slane %v4930_v36, %v5109_v19  ;;  %v612_v13 = vrot.slane %v4930_v36, %v5119_v47 }
  0xc5   : > { %2106 = vmatpush1.bf16.msra.mxu0 %v1901_v58  ;;  %2149 = vmatpush1.bf16.msra.mxu1 %v1903_v1  ;;  %v1910_v48 = vmul.bf16 %v5141_v7, %v1202_v32  ;;  %v1195_v14 = vrot.slane %v1190_v59, %v4771_v6  ;;  %v1253_v24 = vpack.i.b16 %v608_v8, %v608_v8 }
  0xc6   : > { %v1912_v27 = vmul.bf16 %v5191_v23, %v1216_v9  ;;  %v1209_v29 = vrot.slane %v1204_v10, %v4771_v6  ;;  %v1267_v39 = vpack.i.b16 %v616_v42, %v616_v42  ;;  %v1246_v45 = vpack.i.b16 %v604_v38, %v604_v38 }
  0xc7   : > { %2107 = vmatprep.subr.bf16.mxu0 %v1910_v48  ;;  %v1909_v40 = vmul.bf16 %v5130_v60, %v1195_v14  ;;  %v1258_v33 = vrot.slane %v1253_v24, %v4771_v6  ;;  %v1260_v3 = vpack.i.b16 %v612_v13, %v612_v13  ;;  %v640_v36 = vrot.slane %v4843_v49, %v4968_v26 }
  0xc8   : > { %2150 = vmatprep.subr.bf16.mxu1 %v1912_v27  ;;  %v1911_v44 = vmul.bf16 %v5187_v53, %v1209_v29  ;;  %v1272_v35 = vrot.slane %v1267_v39, %v4771_v6  ;;  %v1251_v43 = vrot.slane %v1246_v45, %v4771_v6  ;;  %v648_v41 = vrot.slane %v4843_v49, %v5157_v12 }
  0xc9   : > { %2108 = vmatpush1.bf16.msra.mxu0 %v1909_v40  ;;  %v1918_v51 = vmul.bf16 %v5141_v7, %v1258_v33  ;;  %v1265_v34 = vrot.slane %v1260_v3, %v4771_v6  ;;  %v1309_v28 = vpack.i.b16 %v640_v36, %v640_v36  ;;  %v636_v31 = vrot.slane %v4843_v49, %v5109_v19 }
  0xca   : > { %2151 = vmatpush1.bf16.msra.mxu1 %v1911_v44  ;;  %v1920_v46 = vmul.bf16 %v5191_v23, %v1272_v35  ;;  %v1917_v54 = vmul.bf16 %v5130_v60, %v1251_v43  ;;  %v1323_v52 = vpack.i.b16 %v648_v41, %v648_v41  ;;  %v644_v56 = vrot.slane %v4843_v49, %v5119_v47 }
  0xcb   : > { %2109 = vmatprep.subr.bf16.mxu0 %v1918_v51  ;;  %v1919_v55 = vmul.bf16 %v5187_v53, %v1265_v34  ;;  %v1314_v16 = vrot.slane %v1309_v28, %v4771_v6  ;;  %v1302_v57 = vpack.i.b16 %v636_v31, %v636_v31  ;;  %v672_v58 = vrot.slane %v4965_v25, %v4968_v26 }
  0xcc   : > { %2152 = vmatprep.subr.bf16.mxu1 %v1920_v46  ;;  %v1328_v62 = vrot.slane %v1323_v52, %v4771_v6  ;;  %v1316_v63 = vpack.i.b16 %v644_v56, %v644_v56  ;;  %v680_v1 = vrot.slane %v4965_v25, %v5157_v12  ;;  %v668_v4 = vrot.slane %v4965_v25, %v5109_v19 }
  0xcd   : > { %2110 = vmatpush1.bf16.msra.mxu0 %v1917_v54  ;;  %v1926_v49 = vmul.bf16 %v5141_v7, %v1314_v16  ;;  %v1307_v50 = vrot.slane %v1302_v57, %v4771_v6  ;;  %v1365_v32 = vpack.i.b16 %v672_v58, %v672_v58  ;;  %v676_v59 = vrot.slane %v4965_v25, %v5119_v47 }
  0xce   : > { %2153 = vmatpush1.bf16.msra.mxu1 %v1919_v55  ;;  %v1928_v8 = vmul.bf16 %v5191_v23, %v1328_v62  ;;  %v1321_v42 = vrot.slane %v1316_v63, %v4771_v6  ;;  %v1379_v9 = vpack.i.b16 %v680_v1, %v680_v1  ;;  %v1358_v10 = vpack.i.b16 %v668_v4, %v668_v4 }
  0xcf   : > { %2111 = vmatprep.subr.bf16.mxu0 %v1926_v49  ;;  %v1925_v38 = vmul.bf16 %v5130_v60, %v1307_v50  ;;  %v1370_v13 = vrot.slane %v1365_v32, %v4771_v6  ;;  %v1372_v48 = vpack.i.b16 %v676_v59, %v676_v59  ;;  %v704_v14 = vrot.slane %v5001_v61, %v4968_v26 }
  0xd0   : > { %2154 = vmatprep.subr.bf16.mxu1 %v1928_v8  ;;  %v1927_v24 = vmul.bf16 %v5187_v53, %v1321_v42  ;;  %v1384_v25 = vrot.slane %v1379_v9, %v4771_v6  ;;  %v1363_v27 = vrot.slane %v1358_v10, %v4771_v6  ;;  %v712_v29 = vrot.slane %v5001_v61, %v5157_v12 }
  0xd1   : > { %2112 = vmatpush1.bf16.msra.mxu0 %v1925_v38  ;;  %v1934_v39 = vmul.bf16 %v5141_v7, %v1370_v13  ;;  %v1377_v45 = vrot.slane %v1372_v48, %v4771_v6  ;;  %v1421_v40 = vpack.i.b16 %v704_v14, %v704_v14  ;;  %v700_v33 = vrot.slane %v5001_v61, %v5109_v19 }
  0xd2   : > { %2155 = vmatpush1.bf16.msra.mxu1 %v1927_v24  ;;  %v1936_v3 = vmul.bf16 %v5191_v23, %v1384_v25  ;;  %v1933_v36 = vmul.bf16 %v5130_v60, %v1363_v27  ;;  %v1435_v44 = vpack.i.b16 %v712_v29, %v712_v29  ;;  %v708_v35 = vrot.slane %v5001_v61, %v5119_v47 }
  0xd3   : > { %2113 = vmatprep.subr.bf16.mxu0 %v1934_v39  ;;  %v1935_v43 = vmul.bf16 %v5187_v53, %v1377_v45  ;;  %v1426_v41 = vrot.slane %v1421_v40, %v4771_v6  ;;  %v1414_v51 = vpack.i.b16 %v700_v33, %v700_v33  ;;  %v736_v34 = vrot.slane %v5025_v15, %v4968_v26 }
  0xd4   : > { %2156 = vmatprep.subr.bf16.mxu1 %v1936_v3  ;;  %v1440_v28 = vrot.slane %v1435_v44, %v4771_v6  ;;  %v1428_v31 = vpack.i.b16 %v708_v35, %v708_v35  ;;  %v744_v46 = vrot.slane %v5025_v15, %v5157_v12  ;;  %v732_v54 = vrot.slane %v5025_v15, %v5109_v19 }
  0xd5   : > { %2114 = vmatpush1.bf16.msra.mxu0 %v1933_v36  ;;  %v1942_v61 = vmul.bf16 %v5141_v7, %v1426_v41  ;;  %v1419_v52 = vrot.slane %v1414_v51, %v4771_v6  ;;  %v1477_v56 = vpack.i.b16 %v736_v34, %v736_v34  ;;  %v740_v55 = vrot.slane %v5025_v15, %v5119_v47 }
  0xd6   : > { %2157 = vmatpush1.bf16.msra.mxu1 %v1935_v43  ;;  %v1944_v16 = vmul.bf16 %v5191_v23, %v1440_v28  ;;  %v1433_v57 = vrot.slane %v1428_v31, %v4771_v6  ;;  %v1491_v58 = vpack.i.b16 %v744_v46, %v744_v46  ;;  %v1470_v62 = vpack.i.b16 %v732_v54, %v732_v54 }
  0xd7   : > { %2115 = vmatprep.subr.bf16.mxu0 %v1942_v61  ;;  %v1941_v63 = vmul.bf16 %v5130_v60, %v1419_v52  ;;  %v1482_v1 = vrot.slane %v1477_v56, %v4771_v6  ;;  %v1484_v4 = vpack.i.b16 %v740_v55, %v740_v55  ;;  %v768_v49 = vrot.slane %v5011_v2, %v4968_v26 }
  0xd8   : > { %2158 = vmatprep.subr.bf16.mxu1 %v1944_v16  ;;  %v1943_v50 = vmul.bf16 %v5187_v53, %v1433_v57  ;;  %v1496_v15 = vrot.slane %v1491_v58, %v4771_v6  ;;  %v1475_v32 = vrot.slane %v1470_v62, %v4771_v6  ;;  %v776_v59 = vrot.slane %v5011_v2, %v5157_v12 }
  0xd9   : > { %2116 = vmatpush1.bf16.msra.mxu0 %v1941_v63  ;;  %v1950_v8 = vmul.bf16 %v5141_v7, %v1482_v1  ;;  %v1489_v42 = vrot.slane %v1484_v4, %v4771_v6  ;;  %v1533_v9 = vpack.i.b16 %v768_v49, %v768_v49  ;;  %v764_v10 = vrot.slane %v5011_v2, %v5109_v19 }
  0xda   : > { %2159 = vmatpush1.bf16.msra.mxu1 %v1943_v50  ;;  %v1952_v38 = vmul.bf16 %v5191_v23, %v1496_v15  ;;  %v1949_v13 = vmul.bf16 %v5130_v60, %v1475_v32  ;;  %v1547_v48 = vpack.i.b16 %v776_v59, %v776_v59  ;;  %v772_v14 = vrot.slane %v5011_v2, %v5119_v47 }
  0xdb   : > { %2117 = vmatprep.subr.bf16.mxu0 %v1950_v8  ;;  %v1951_v24 = vmul.bf16 %v5187_v53, %v1489_v42  ;;  %v1538_v25 = vrot.slane %v1533_v9, %v4771_v6  ;;  %v1526_v27 = vpack.i.b16 %v764_v10, %v764_v10  ;;  %v800_v29 = vrot.slane %v5065_v37, %v4968_v26 }
  0xdc   : > { %2160 = vmatprep.subr.bf16.mxu1 %v1952_v38  ;;  %v1552_v39 = vrot.slane %v1547_v48, %v4771_v6  ;;  %v1540_v45 = vpack.i.b16 %v772_v14, %v772_v14  ;;  %v808_v40 = vrot.slane %v5065_v37, %v5157_v12  ;;  %v796_v33 = vrot.slane %v5065_v37, %v5109_v19 }
  0xdd   : > { %2118 = vmatpush1.bf16.msra.mxu0 %v1949_v13  ;;  %v1958_v2 = vmul.bf16 %v5141_v7, %v1538_v25  ;;  %v1531_v3 = vrot.slane %v1526_v27, %v4771_v6  ;;  %v1589_v36 = vpack.i.b16 %v800_v29, %v800_v29  ;;  %v804_v44 = vrot.slane %v5065_v37, %v5119_v47 }
  0xde   : > { %2161 = vmatpush1.bf16.msra.mxu1 %v1951_v24  ;;  %v1960_v35 = vmul.bf16 %v5191_v23, %v1552_v39  ;;  %v1545_v43 = vrot.slane %v1540_v45, %v4771_v6  ;;  %v1603_v41 = vpack.i.b16 %v808_v40, %v808_v40  ;;  %v1582_v51 = vpack.i.b16 %v796_v33, %v796_v33 }
  0xdf   : > { %2119 = vmatprep.subr.bf16.mxu0 %v1958_v2  ;;  %v1957_v34 = vmul.bf16 %v5130_v60, %v1531_v3  ;;  %v1594_v28 = vrot.slane %v1589_v36, %v4771_v6  ;;  %v1596_v31 = vpack.i.b16 %v804_v44, %v804_v44  ;;  %v832_v46 = vrot.slane %v5069_v20, %v4968_v26 }
  0xe0   : > { %2162 = vmatprep.subr.bf16.mxu1 %v1960_v35  ;;  %v1959_v54 = vmul.bf16 %v5187_v53, %v1545_v43  ;;  %v1608_v37 = vrot.slane %v1603_v41, %v4771_v6  ;;  %v1587_v61 = vrot.slane %v1582_v51, %v4771_v6  ;;  %v840_v52 = vrot.slane %v5069_v20, %v5157_v12 }
  0xe1   : > { %2120 = vmatpush1.bf16.msra.mxu0 %v1957_v34  ;;  %v1966_v56 = vmul.bf16 %v5141_v7, %v1594_v28  ;;  %v1601_v55 = vrot.slane %v1596_v31, %v4771_v6  ;;  %v1645_v16 = vpack.i.b16 %v832_v46, %v832_v46  ;;  %v828_v57 = vrot.slane %v5069_v20, %v5109_v19 }
  0xe2   : > { %2163 = vmatpush1.bf16.msra.mxu1 %v1959_v54  ;;  %v1968_v58 = vmul.bf16 %v5191_v23, %v1608_v37  ;;  %v1965_v62 = vmul.bf16 %v5130_v60, %v1587_v61  ;;  %v1659_v63 = vpack.i.b16 %v840_v52, %v840_v52  ;;  %v836_v1 = vrot.slane %v5069_v20, %v5119_v47 }
  0xe3   : > { %2121 = vmatprep.subr.bf16.mxu0 %v1966_v56  ;;  %v1967_v4 = vmul.bf16 %v5187_v53, %v1601_v55  ;;  %v1650_v49 = vrot.slane %v1645_v16, %v4771_v6  ;;  %v1638_v50 = vpack.i.b16 %v828_v57, %v828_v57  ;;  %v864_v15 = vrot.slane %v5071_v22, %v4968_v26 }
  0xe4   : > { %2164 = vmatprep.subr.bf16.mxu1 %v1968_v58  ;;  %v1664_v32 = vrot.slane %v1659_v63, %v4771_v6  ;;  %v1652_v59 = vpack.i.b16 %v836_v1, %v836_v1  ;;  %v872_v8 = vrot.slane %v5071_v22, %v5157_v12  ;;  %v860_v42 = vrot.slane %v5071_v22, %v5109_v19 }
  0xe5   : > { %2122 = vmatpush1.bf16.msra.mxu0 %v1965_v62  ;;  %v1974_v20 = vmul.bf16 %v5141_v7, %v1650_v49  ;;  %v1643_v9 = vrot.slane %v1638_v50, %v4771_v6  ;;  %v1701_v10 = vpack.i.b16 %v864_v15, %v864_v15  ;;  %v868_v38 = vrot.slane %v5071_v22, %v5119_v47 }
  0xe6   : > { %2165 = vmatpush1.bf16.msra.mxu1 %v1967_v4  ;;  %v1976_v13 = vmul.bf16 %v5191_v23, %v1664_v32  ;;  %v1657_v48 = vrot.slane %v1652_v59, %v4771_v6  ;;  %v1715_v14 = vpack.i.b16 %v872_v8, %v872_v8  ;;  %v1694_v24 = vpack.i.b16 %v860_v42, %v860_v42 }
  0xe7   : > { %2123 = vmatprep.subr.bf16.mxu0 %v1974_v20  ;;  %v1973_v25 = vmul.bf16 %v5130_v60, %v1643_v9  ;;  %v1706_v27 = vrot.slane %v1701_v10, %v4771_v6  ;;  %v1708_v29 = vpack.i.b16 %v868_v38, %v868_v38  ;;  %v896_v39 = vrot.slane %v5134_v0, %v4968_v26 }
  0xe8   : > { %2166 = vmatprep.subr.bf16.mxu1 %v1976_v13  ;;  %v1975_v45 = vmul.bf16 %v5187_v53, %v1657_v48  ;;  %v1720_v22 = vrot.slane %v1715_v14, %v4771_v6  ;;  %v1699_v40 = vrot.slane %v1694_v24, %v4771_v6  ;;  %v904_v33 = vrot.slane %v5134_v0, %v5157_v12 }
  0xe9   : > { %2124 = vmatpush1.bf16.msra.mxu0 %v1973_v25  ;;  %v1982_v2 = vmul.bf16 %v5141_v7, %v1706_v27  ;;  %v1713_v3 = vrot.slane %v1708_v29, %v4771_v6  ;;  %v1757_v36 = vpack.i.b16 %v896_v39, %v896_v39  ;;  %v892_v44 = vrot.slane %v5134_v0, %v5109_v19 }
  0xea   : > { %2167 = vmatpush1.bf16.msra.mxu1 %v1975_v45  ;;  %v1984_v35 = vmul.bf16 %v5191_v23, %v1720_v22  ;;  %v1981_v43 = vmul.bf16 %v5130_v60, %v1699_v40  ;;  %v1771_v41 = vpack.i.b16 %v904_v33, %v904_v33  ;;  %v900_v51 = vrot.slane %v5134_v0, %v5119_v47 }
  0xeb   : > { %2125 = vmatprep.subr.bf16.mxu0 %v1982_v2  ;;  %v1983_v34 = vmul.bf16 %v5187_v53, %v1713_v3  ;;  %v1762_v28 = vrot.slane %v1757_v36, %v4771_v6  ;;  %v1750_v31 = vpack.i.b16 %v892_v44, %v892_v44  ;;  %v928_v46 = vrot.slane %v5154_v11, %v4968_v26  ;;  %v5458_v2 = vld [vmem:[#allocation5 + $0x4] ss:$8 sps:$4 sm:$0xff]  }
  0xec   : > { %2168 = vmatprep.subr.bf16.mxu1 %v1984_v35  ;;  %v1776_v54 = vrot.slane %v1771_v41, %v4771_v6  ;;  %v1764_v37 = vpack.i.b16 %v900_v51, %v900_v51  ;;  %v936_v61 = vrot.slane %v5154_v11, %v5157_v12  ;;  %v924_v52 = vrot.slane %v5154_v11, %v5109_v19 }
  0xed   : > { %2126 = vmatpush1.bf16.msra.mxu0 %v1981_v43  ;;  %v1990_v0 = vmul.bf16 %v5141_v7, %v1762_v28  ;;  %v1755_v56 = vrot.slane %v1750_v31, %v4771_v6  ;;  %v1813_v55 = vpack.i.b16 %v928_v46, %v928_v46  ;;  %v932_v16 = vrot.slane %v5154_v11, %v5119_v47  ;;  %v249_v31 = vld [vmem:[%s4755_s11 + $0x80] sm:$0xff] }
  0xee   : > { %2169 = vmatpush1.bf16.msra.mxu1 %v1983_v34  ;;  %v1992_v57 = vmul.bf16 %v5191_v23, %v1776_v54  ;;  %v1769_v58 = vrot.slane %v1764_v37, %v4771_v6  ;;  %v1827_v62 = vpack.i.b16 %v936_v61, %v936_v61  ;;  %v1806_v63 = vpack.i.b16 %v924_v52, %v924_v52  ;;  %v253_v46 = vld [vmem:[%s4755_s11 + $0xa0] sm:$0xff] }
  0xef   : > { %2127 = vmatprep.subr.bf16.mxu0 %v1990_v0  ;;  %v1989_v1 = vmul.bf16 %v5130_v60, %v1755_v56  ;;  %v1818_v4 = vrot.slane %v1813_v55, %v4771_v6  ;;  %v1820_v49 = vpack.i.b16 %v932_v16, %v932_v16  ;;  %v250_v56 = vld [vmem:[%s4755_s11 + $0x88] sm:$0xff] }
  0xf0   : > { %2170 = vmatprep.subr.bf16.mxu1 %v1992_v57  ;;  %v1991_v50 = vmul.bf16 %v5187_v53, %v1769_v58  ;;  %v1832_v15 = vrot.slane %v1827_v62, %v4771_v6  ;;  %v1811_v11 = vrot.slane %v1806_v63, %v4771_v6  ;;  %v254_v55 = vld [vmem:[%s4755_s11 + $0xa8] sm:$0xff]  ;;  %v5469_v57 = vcombine.low %v249_v31, %v253_v46 }
  0xf1   : > { %2128 = vmatpush1.bf16.msra.mxu0 %v1989_v1  ;;  %v1998_v32 = vmul.bf16 %v5141_v7, %v1818_v4  ;;  %v1825_v59 = vrot.slane %v1820_v49, %v4771_v6  ;;  %v5472_v1 = vcombine.high %v249_v31, %v253_v46  ;;  %v251_v4 = vld [vmem:[%s4755_s11 + $0x90] sm:$0xff] }
  0xf2   : > { %2171 = vmatpush1.bf16.msra.mxu1 %v1991_v50  ;;  %v2000_v8 = vmul.bf16 %v5191_v23, %v1832_v15  ;;  %v1997_v42 = vmul.bf16 %v5130_v60, %v1811_v11  ;;  %v255_v49 = vld [vmem:[%s4755_s11 + $0xb0] sm:$0xff]  ;;  %v5478_v11 = vcombine.low %v250_v56, %v254_v55 }
  0xf3   : > { %2129 = vmatprep.subr.bf16.mxu0 %v1998_v32  ;;  %v1999_v20 = vmul.bf16 %v5187_v53, %v1825_v59  ;;  %v5480_v32 = vcombine.high %v250_v56, %v254_v55 }
  0xf4   : > { %2172 = vmatprep.subr.bf16.mxu1 %v2000_v8 }
  0xf5   : > { %2130 = vmatpush1.bf16.msra.mxu0 %v1997_v42 }
  0xf6   : > { %2173 = vmatpush1.bf16.msra.mxu1 %v1999_v20 }
  0xf8   : > { %2132 = vmatmul.mubr.bf16.vlgmr.msra.gmra.mrb[4].mxu0 %v5202_v30 }
  0xf9   : > { %2175 = vmatmul.mubr.bf16.vlgmr.msra.gmra.mrb[4].mxu1 %v5202_v30  ;;  %4001 = vmatprep.mubr.bf16.mxu0 %v5458_v2 }
  0xfa   : > { %4044 = vmatprep.mubr.bf16.mxu1 %v5458_v2 }
 0x189   : > { %v2047_v9 = vpop.f32.mrb[0].mxu0  ;;  %v2090_v10 = vpop.f32.mrb[0].mxu1 }
 0x18a   : > { %v2049_v7 = vpop.f32.mrb[1].mxu0  ;;  %v2092_v38 = vpop.f32.mrb[1].mxu1 }
 0x18b   : > { %v4337_v13 = vpack.c.bf16 %v2049_v7, %v2047_v9  ;;  %v4339_v48 = vpack.c.bf16 %v2092_v38, %v2090_v10  ;;  %v2051_v14 = vpop.f32.mrb[2].mxu0  ;;  %v2094_v23 = vpop.f32.mrb[2].mxu1  ;;  %v252_v9 = vld [vmem:[%s4755_s11 + $0x98] sm:$0xff] }
 0x18c   : > { %v2053_v24 = vpop.f32.mrb[3].mxu0  ;;  %v2096_v60 = vpop.f32.mrb[3].mxu1  ;;  %v256_v10 = vld [vmem:[%s4755_s11 + $0xb8] sm:$0xff]  ;;  %s4504_s11 = scalar_lea.vmem %s6089_s20, 2048 }
 0x18d   : > { %v2215_v25 = vrot.slane %v4337_v13, %v4768_v5  ;;  %v2229_v53 = vrot.slane %v4339_v48, %v4768_v5  ;;  %v4338_v27 = vpack.c.bf16 %v2053_v24, %v2051_v14  ;;  %v4340_v29 = vpack.c.bf16 %v2096_v60, %v2094_v23  ;;  %p4505_p7 = scmp.ne.s32.totalorder %s6089_s20, %s4504_s11  ;;  %p4512_p8 = scmp.lt.s32.totalorder %s4510_s9, %s4504_s11 }
 0x18e   : > { %v5488_v13 = vcombine.low %v251_v4, %v255_v49  ;;  %v5490_v48 = vcombine.high %v251_v4, %v255_v49 }
 0x18f   : > { %v2265_v39 = vcombine.low %v2215_v25, %v2229_v53  ;;  %v2266_v45 = vcombine.high %v2215_v25, %v2229_v53  ;;  %v2222_v30 = vrot.slane %v4338_v27, %v4768_v5  ;;  %v2236_v22 = vrot.slane %v4340_v29, %v4768_v5  ;;  %p4506_p10 = pnand %p4505_p7, %p6157_p9  ;;  %p4513_p5 = por %p4512_p8, %p4511_p3 }
 0x190   : > { %v5494_v27 = vcombine.low %v252_v9, %v256_v10  ;;  %v5496_v29 = vcombine.high %v252_v9, %v256_v10 }
 0x191   : > { %v2267_v40 = vcombine.low %v2222_v30, %v2236_v22  ;;  %v2268_v33 = vcombine.high %v2222_v30, %v2236_v22  ;;  %v2279_v50 = vrot.slane %v2265_v39, %v4768_v5  ;;  %v2293_v15 = vrot.slane %v2266_v45, %v4768_v5  ;;  %p4507_p1 = pneg %p4506_p10 }
 0x193   : > { %v2286_v7 = vrot.slane %v2267_v40, %v4768_v5  ;;  %v2300_v38 = vrot.slane %v2268_v33, %v4768_v5  ;;  %p4514_p11 = pnand %p4513_p5, %p4507_p1 }
 0x1cb   : > { %v2133_v3 = vpop.f32.mrb[4].mxu0 }
 0x1cc   : > { %v2176_v36 = vpop.f32.mrb[4].mxu1  ;;  %v2135_v44 = vpop.f32.mrb[5].mxu0 }
 0x1cd   : > { %v4341_v35 = vpack.c.bf16 %v2135_v44, %v2133_v3  ;;  %v2178_v43 = vpop.f32.mrb[5].mxu1  ;;  %v2137_v41 = vpop.f32.mrb[6].mxu0 }
 0x1ce   : > { %v4343_v51 = vpack.c.bf16 %v2178_v43, %v2176_v36  ;;  %v2180_v34 = vpop.f32.mrb[6].mxu1  ;;  %v2139_v28 = vpop.f32.mrb[7].mxu0 }
 0x1cf   : > { %v2243_v54 = vrot.slane %v4341_v35, %v4768_v5  ;;  %v4342_v37 = vpack.c.bf16 %v2139_v28, %v2137_v41  ;;  %v2182_v61 = vpop.f32.mrb[7].mxu1 }
 0x1d0   : > { %v2257_v52 = vrot.slane %v4343_v51, %v4768_v5  ;;  %v4344_v0 = vpack.c.bf16 %v2182_v61, %v2180_v34 }
 0x1d1   : > { %v2250_v16 = vrot.slane %v4342_v37, %v4768_v5 }
 0x1d2   : > { %v2269_v58 = vcombine.low %v2243_v54, %v2257_v52  ;;  %v2270_v62 = vcombine.high %v2243_v54, %v2257_v52  ;;  %v2264_v63 = vrot.slane %v4344_v0, %v4768_v5 }
 0x1d4   : > { %v2307_v59 = vrot.slane %v2269_v58, %v4768_v5  ;;  %v2321_v8 = vrot.slane %v2270_v62, %v4768_v5  ;;  %v2271_v42 = vcombine.low %v2250_v16, %v2264_v63  ;;  %v2272_v20 = vcombine.high %v2250_v16, %v2264_v63 }
 0x1d6   : > { %v2329_v14 = vcombine.low %v2279_v50, %v2307_v59  ;;  %v2330_v23 = vcombine.high %v2279_v50, %v2307_v59  ;;  %v2333_v24 = vcombine.low %v2293_v15, %v2321_v8  ;;  %v2334_v60 = vcombine.high %v2293_v15, %v2321_v8 }
 0x1d7   : > { %v2314_v25 = vrot.slane %v2271_v42, %v4768_v5  ;;  %v2328_v53 = vrot.slane %v2272_v20, %v4768_v5 }
 0x1d8   : > { %v2338_v39 = vunpack.i.h.s16 %v2329_v14  ;;  %v2340_v45 = vunpack.i.h.s16 %v2333_v24  ;;  %v2342_v30 = vunpack.i.h.s16 %v2330_v23  ;;  %v2344_v22 = vunpack.i.h.s16 %v2334_v60 }
 0x1d9   : > { %v5498_v40 = vpack.i.b16 %v2329_v14, %v2329_v14  ;;  %v5500_v33 = vpack.i.b16 %v2333_v24, %v2333_v24  ;;  %v5502_v3 = vpack.i.b16 %v2330_v23, %v2330_v23  ;;  %v5504_v36 = vpack.i.b16 %v2334_v60, %v2334_v60 }
 0x1da   : > { %v5506_v44 = vpack.i.b16 %v2338_v39, %v2338_v39  ;;  %v5508_v35 = vpack.i.b16 %v2340_v45, %v2340_v45  ;;  %v5510_v5 = vpack.i.b16 %v2342_v30, %v2342_v30  ;;  %v5512_v43 = vpack.i.b16 %v2344_v22, %v2344_v22 }
 0x1db   : > { %v2331_v41 = vcombine.low %v2286_v7, %v2314_v25  ;;  %v2332_v51 = vcombine.high %v2286_v7, %v2314_v25  ;;  %v2335_v34 = vcombine.low %v2300_v38, %v2328_v53  ;;  %v2336_v28 = vcombine.high %v2300_v38, %v2328_v53 }
 0x1dc   : > { %v2376_v31 = vrot.slane %v5498_v40, %v4780_v17  ;;  %v2384_v46 = vrot.slane %v5498_v40, %v4788_v21  ;;  %v2372_v54 = vrot.slane %v5498_v40, %v4771_v6  ;;  %v2380_v37 = vrot.slane %v5498_v40, %v4783_v18 }
 0x1dd   : > { %v2346_v61 = vunpack.i.h.s16 %v2331_v41  ;;  %v2348_v52 = vunpack.i.h.s16 %v2335_v34  ;;  %v2350_v0 = vunpack.i.h.s16 %v2332_v51  ;;  %v2352_v56 = vunpack.i.h.s16 %v2336_v28 }
 0x1de   : > { %v5522_v55 = vpack.i.b16 %v2331_v41, %v2331_v41  ;;  %v5524_v16 = vpack.i.b16 %v2335_v34, %v2335_v34  ;;  %v5526_v58 = vpack.i.b16 %v2332_v51, %v2332_v51  ;;  %v5528_v62 = vpack.i.b16 %v2336_v28, %v2336_v28 }
 0x1df   : > { %v5530_v63 = vpack.i.b16 %v2346_v61, %v2346_v61  ;;  %v5532_v4 = vpack.i.b16 %v2348_v52, %v2348_v52  ;;  %v5534_v49 = vpack.i.b16 %v2350_v0, %v2350_v0  ;;  %v5536_v50 = vpack.i.b16 %v2352_v56, %v2352_v56 }
 0x1e0   : > { %v2889_v15 = vpack.i.b16 %v2376_v31, %v2376_v31  ;;  %v2903_v59 = vpack.i.b16 %v2384_v46, %v2384_v46  ;;  %v2882_v8 = vpack.i.b16 %v2372_v54, %v2372_v54  ;;  %v2896_v42 = vpack.i.b16 %v2380_v37, %v2380_v37 }
 0x1e1   : > { %v2408_v20 = vrot.slane %v5506_v44, %v4780_v17  ;;  %v2416_v9 = vrot.slane %v5506_v44, %v4788_v21  ;;  %v2404_v10 = vrot.slane %v5506_v44, %v4771_v6  ;;  %v2412_v7 = vrot.slane %v5506_v44, %v4783_v18 }
 0x1e2   : > { %v2894_v38 = vrot.slane %v2889_v15, %v4771_v6  ;;  %v2908_v14 = vrot.slane %v2903_v59, %v4771_v6  ;;  %v2887_v23 = vrot.slane %v2882_v8, %v4771_v6  ;;  %v2901_v24 = vrot.slane %v2896_v42, %v4771_v6 }
 0x1e3   : > { %v2945_v60 = vpack.i.b16 %v2408_v20, %v2408_v20  ;;  %v2959_v25 = vpack.i.b16 %v2416_v9, %v2416_v9  ;;  %v2938_v53 = vpack.i.b16 %v2404_v10, %v2404_v10  ;;  %v2952_v39 = vpack.i.b16 %v2412_v7, %v2412_v7 }
 0x1e4   : > { %v3818_v45 = vmul.bf16 %v5472_v1, %v2894_v38  ;;  %v3820_v30 = vmul.bf16 %v5480_v32, %v2908_v14  ;;  %v3817_v22 = vmul.bf16 %v5469_v57, %v2887_v23  ;;  %v3819_v41 = vmul.bf16 %v5478_v11, %v2901_v24 }
 0x1e5   : > { %v2950_v51 = vrot.slane %v2945_v60, %v4771_v6  ;;  %v2964_v34 = vrot.slane %v2959_v25, %v4771_v6  ;;  %v2943_v28 = vrot.slane %v2938_v53, %v4771_v6  ;;  %v2957_v31 = vrot.slane %v2952_v39, %v4771_v6 }
 0x1e6   : > { %3969 = vmatprep.subr.bf16.mxu0 %v3818_v45  ;;  %4012 = vmatprep.subr.bf16.mxu1 %v3820_v30  ;;  %v2440_v46 = vrot.slane %v5500_v33, %v4780_v17  ;;  %v2448_v54 = vrot.slane %v5500_v33, %v4788_v21  ;;  %v2436_v37 = vrot.slane %v5500_v33, %v4771_v6 }
 0x1e7   : > { %3970 = vmatpush1.bf16.msra.mxu0 %v3817_v22  ;;  %4013 = vmatpush1.bf16.msra.mxu1 %v3819_v41  ;;  %v3826_v61 = vmul.bf16 %v5472_v1, %v2950_v51  ;;  %v3828_v52 = vmul.bf16 %v5480_v32, %v2964_v34  ;;  %v3825_v0 = vmul.bf16 %v5469_v57, %v2943_v28 }
 0x1e8   : > { %v3827_v56 = vmul.bf16 %v5478_v11, %v2957_v31  ;;  %v3001_v15 = vpack.i.b16 %v2440_v46, %v2440_v46  ;;  %v3015_v59 = vpack.i.b16 %v2448_v54, %v2448_v54  ;;  %v2994_v8 = vpack.i.b16 %v2436_v37, %v2436_v37 }
 0x1e9   : > { %3971 = vmatprep.subr.bf16.mxu0 %v3826_v61  ;;  %4014 = vmatprep.subr.bf16.mxu1 %v3828_v52  ;;  %v2444_v42 = vrot.slane %v5500_v33, %v4783_v18  ;;  %v2472_v20 = vrot.slane %v5508_v35, %v4780_v17  ;;  %v2480_v9 = vrot.slane %v5508_v35, %v4788_v21 }
 0x1ea   : > { %v3006_v10 = vrot.slane %v3001_v15, %v4771_v6  ;;  %v3020_v7 = vrot.slane %v3015_v59, %v4771_v6  ;;  %v2999_v38 = vrot.slane %v2994_v8, %v4771_v6  ;;  %v2468_v14 = vrot.slane %v5508_v35, %v4771_v6 }
 0x1eb   : > { %3972 = vmatpush1.bf16.msra.mxu0 %v3825_v0  ;;  %4015 = vmatpush1.bf16.msra.mxu1 %v3827_v56  ;;  %v3008_v23 = vpack.i.b16 %v2444_v42, %v2444_v42  ;;  %v3057_v24 = vpack.i.b16 %v2472_v20, %v2472_v20  ;;  %v3071_v60 = vpack.i.b16 %v2480_v9, %v2480_v9  ;;  %v4584_v59 = vmov 0   ;;  %v3947_v9 = vld [vmem:[%s6138_s3] sm:$0xff] }
 0x1ec   : > { %v3834_v25 = vmul.bf16 %v5472_v1, %v3006_v10  ;;  %v3836_v53 = vmul.bf16 %v5480_v32, %v3020_v7  ;;  %v3833_v39 = vmul.bf16 %v5469_v57, %v2999_v38  ;;  %v3050_v45 = vpack.i.b16 %v2468_v14, %v2468_v14  ;;  %4439 = vset.pattern.permute.xlu0 %v4584_v59 }
 0x1ed   : > { %v3013_v30 = vrot.slane %v3008_v23, %v4771_v6  ;;  %v3062_v22 = vrot.slane %v3057_v24, %v4771_v6  ;;  %v3076_v41 = vrot.slane %v3071_v60, %v4771_v6  ;;  %v2476_v51 = vrot.slane %v5508_v35, %v4783_v18  ;;  %3951 = vperm.xlu0 %4439, %v3947_v9  }
 0x1ee   : > { %3973 = vmatprep.subr.bf16.mxu0 %v3834_v25  ;;  %4016 = vmatprep.subr.bf16.mxu1 %v3836_v53  ;;  %v3055_v34 = vrot.slane %v3050_v45, %v4771_v6  ;;  %v2504_v28 = vrot.slane %v5502_v3, %v4780_v17  ;;  %v2512_v31 = vrot.slane %v5502_v3, %v4788_v21 }
 0x1ef   : > { %3974 = vmatpush1.bf16.msra.mxu0 %v3833_v39  ;;  %v3835_v46 = vmul.bf16 %v5478_v11, %v3013_v30  ;;  %v3842_v54 = vmul.bf16 %v5472_v1, %v3062_v22  ;;  %v3844_v37 = vmul.bf16 %v5480_v32, %v3076_v41  ;;  %v3064_v61 = vpack.i.b16 %v2476_v51, %v2476_v51 }
 0x1f0   : > { %v3841_v52 = vmul.bf16 %v5469_v57, %v3055_v34  ;;  %v3113_v0 = vpack.i.b16 %v2504_v28, %v2504_v28  ;;  %v3127_v56 = vpack.i.b16 %v2512_v31, %v2512_v31  ;;  %v2500_v15 = vrot.slane %v5502_v3, %v4771_v6 }
 0x1f1   : > { %4017 = vmatpush1.bf16.msra.mxu1 %v3835_v46  ;;  %3975 = vmatprep.subr.bf16.mxu0 %v3842_v54  ;;  %v3069_v8 = vrot.slane %v3064_v61, %v4771_v6  ;;  %v2508_v42 = vrot.slane %v5502_v3, %v4783_v18  ;;  %v2536_v20 = vrot.slane %v5510_v5, %v4780_v17 }
 0x1f2   : > { %4018 = vmatprep.subr.bf16.mxu1 %v3844_v37  ;;  %v3118_v10 = vrot.slane %v3113_v0, %v4771_v6  ;;  %v3132_v7 = vrot.slane %v3127_v56, %v4771_v6  ;;  %v3106_v38 = vpack.i.b16 %v2500_v15, %v2500_v15  ;;  %v2544_v14 = vrot.slane %v5510_v5, %v4788_v21 }
 0x1f3   : > { %3976 = vmatpush1.bf16.msra.mxu0 %v3841_v52  ;;  %v3843_v23 = vmul.bf16 %v5478_v11, %v3069_v8  ;;  %v3120_v24 = vpack.i.b16 %v2508_v42, %v2508_v42  ;;  %v3169_v60 = vpack.i.b16 %v2536_v20, %v2536_v20  ;;  %v2532_v25 = vrot.slane %v5510_v5, %v4771_v6  ;;  %v3948_v8 = vld [vmem:[%s6138_s3 + $0x8] sm:$0xff] }
 0x1f4   : > { %v3850_v53 = vmul.bf16 %v5472_v1, %v3118_v10  ;;  %v3852_v39 = vmul.bf16 %v5480_v32, %v3132_v7  ;;  %v3111_v45 = vrot.slane %v3106_v38, %v4771_v6  ;;  %v3183_v30 = vpack.i.b16 %v2544_v14, %v2544_v14  ;;  %3956 = vperm.xlu0 %4439, %v3948_v8  }
 0x1f5   : > { %4019 = vmatpush1.bf16.msra.mxu1 %v3843_v23  ;;  %v3125_v22 = vrot.slane %v3120_v24, %v4771_v6  ;;  %v3174_v41 = vrot.slane %v3169_v60, %v4771_v6  ;;  %v3162_v51 = vpack.i.b16 %v2532_v25, %v2532_v25  ;;  %v2540_v34 = vrot.slane %v5510_v5, %v4783_v18 }
 0x1f6   : > { %3977 = vmatprep.subr.bf16.mxu0 %v3850_v53  ;;  %4020 = vmatprep.subr.bf16.mxu1 %v3852_v39  ;;  %v3849_v28 = vmul.bf16 %v5469_v57, %v3111_v45  ;;  %v3188_v31 = vrot.slane %v3183_v30, %v4771_v6  ;;  %v2568_v46 = vrot.slane %v5504_v36, %v4780_v17 }
 0x1f7   : > { %v3851_v54 = vmul.bf16 %v5478_v11, %v3125_v22  ;;  %v3858_v37 = vmul.bf16 %v5472_v1, %v3174_v41  ;;  %v3167_v61 = vrot.slane %v3162_v51, %v4771_v6  ;;  %v3176_v52 = vpack.i.b16 %v2540_v34, %v2540_v34 }
 0x1f8   : > { %3978 = vmatpush1.bf16.msra.mxu0 %v3849_v28  ;;  %v3860_v0 = vmul.bf16 %v5480_v32, %v3188_v31  ;;  %v3225_v56 = vpack.i.b16 %v2568_v46, %v2568_v46  ;;  %v2576_v15 = vrot.slane %v5504_v36, %v4788_v21  ;;  %v2564_v59 = vrot.slane %v5504_v36, %v4771_v6 }
 0x1f9   : > { %4021 = vmatpush1.bf16.msra.mxu1 %v3851_v54  ;;  %3979 = vmatprep.subr.bf16.mxu0 %v3858_v37  ;;  %v3857_v42 = vmul.bf16 %v5469_v57, %v3167_v61  ;;  %v3181_v20 = vrot.slane %v3176_v52, %v4771_v6  ;;  %v2572_v9 = vrot.slane %v5504_v36, %v4783_v18 }
 0x1fa   : > { %4022 = vmatprep.subr.bf16.mxu1 %v3860_v0  ;;  %v3230_v10 = vrot.slane %v3225_v56, %v4771_v6  ;;  %v3239_v7 = vpack.i.b16 %v2576_v15, %v2576_v15  ;;  %v3218_v38 = vpack.i.b16 %v2564_v59, %v2564_v59  ;;  %v2600_v14 = vrot.slane %v5512_v43, %v4780_v17 }
 0x1fb   : > { %v3859_v23 = vmul.bf16 %v5478_v11, %v3181_v20  ;;  %v3232_v24 = vpack.i.b16 %v2572_v9, %v2572_v9  ;;  %v2608_v60 = vrot.slane %v5512_v43, %v4788_v21  ;;  %v2596_v25 = vrot.slane %v5512_v43, %v4771_v6 }
 0x1fc   : > { %3980 = vmatpush1.bf16.msra.mxu0 %v3857_v42  ;;  %v3866_v53 = vmul.bf16 %v5472_v1, %v3230_v10  ;;  %v3244_v39 = vrot.slane %v3239_v7, %v4771_v6  ;;  %v3223_v45 = vrot.slane %v3218_v38, %v4771_v6  ;;  %v3281_v30 = vpack.i.b16 %v2600_v14, %v2600_v14 }
 0x1fd   : > { %4023 = vmatpush1.bf16.msra.mxu1 %v3859_v23  ;;  %v3237_v22 = vrot.slane %v3232_v24, %v4771_v6  ;;  %v3295_v41 = vpack.i.b16 %v2608_v60, %v2608_v60  ;;  %v3274_v51 = vpack.i.b16 %v2596_v25, %v2596_v25  ;;  %v2604_v34 = vrot.slane %v5512_v43, %v4783_v18 }
 0x1fe   : > { %3981 = vmatprep.subr.bf16.mxu0 %v3866_v53  ;;  %v3868_v28 = vmul.bf16 %v5480_v32, %v3244_v39  ;;  %v3865_v31 = vmul.bf16 %v5469_v57, %v3223_v45  ;;  %v3286_v46 = vrot.slane %v3281_v30, %v4771_v6  ;;  %v2632_v54 = vrot.slane %v5522_v55, %v4780_v17 }
 0x1ff   : > { %v3867_v37 = vmul.bf16 %v5478_v11, %v3237_v22  ;;  %v3300_v61 = vrot.slane %v3295_v41, %v4771_v6  ;;  %v3279_v52 = vrot.slane %v3274_v51, %v4771_v6  ;;  %v3288_v0 = vpack.i.b16 %v2604_v34, %v2604_v34 }
 0x200   : > { %4024 = vmatprep.subr.bf16.mxu1 %v3868_v28  ;;  %3982 = vmatpush1.bf16.msra.mxu0 %v3865_v31  ;;  %v3874_v56 = vmul.bf16 %v5472_v1, %v3286_v46  ;;  %v3337_v15 = vpack.i.b16 %v2632_v54, %v2632_v54  ;;  %v2640_v59 = vrot.slane %v5522_v55, %v4788_v21 }
 0x201   : > { %4025 = vmatpush1.bf16.msra.mxu1 %v3867_v37  ;;  %v3876_v8 = vmul.bf16 %v5480_v32, %v3300_v61  ;;  %v3873_v42 = vmul.bf16 %v5469_v57, %v3279_v52  ;;  %v3293_v20 = vrot.slane %v3288_v0, %v4771_v6  ;;  %v2628_v9 = vrot.slane %v5522_v55, %v4771_v6 }
 0x202   : > { %3983 = vmatprep.subr.bf16.mxu0 %v3874_v56  ;;  %v3342_v10 = vrot.slane %v3337_v15, %v4771_v6  ;;  %v3351_v7 = vpack.i.b16 %v2640_v59, %v2640_v59  ;;  %v2636_v38 = vrot.slane %v5522_v55, %v4783_v18  ;;  %v2664_v14 = vrot.slane %v5530_v63, %v4780_v17 }
 0x203   : > { %4026 = vmatprep.subr.bf16.mxu1 %v3876_v8  ;;  %v3875_v23 = vmul.bf16 %v5478_v11, %v3293_v20  ;;  %v3330_v24 = vpack.i.b16 %v2628_v9, %v2628_v9  ;;  %v2672_v60 = vrot.slane %v5530_v63, %v4788_v21  ;;  %v2660_v25 = vrot.slane %v5530_v63, %v4771_v6 }
 0x204   : > { %3984 = vmatpush1.bf16.msra.mxu0 %v3873_v42  ;;  %v3882_v53 = vmul.bf16 %v5472_v1, %v3342_v10  ;;  %v3356_v39 = vrot.slane %v3351_v7, %v4771_v6  ;;  %v3344_v45 = vpack.i.b16 %v2636_v38, %v2636_v38  ;;  %v3393_v30 = vpack.i.b16 %v2664_v14, %v2664_v14 }
 0x205   : > { %4027 = vmatpush1.bf16.msra.mxu1 %v3875_v23  ;;  %v3335_v22 = vrot.slane %v3330_v24, %v4771_v6  ;;  %v3407_v41 = vpack.i.b16 %v2672_v60, %v2672_v60  ;;  %v3386_v51 = vpack.i.b16 %v2660_v25, %v2660_v25  ;;  %v2668_v34 = vrot.slane %v5530_v63, %v4783_v18 }
 0x206   : > { %3985 = vmatprep.subr.bf16.mxu0 %v3882_v53  ;;  %v3884_v28 = vmul.bf16 %v5480_v32, %v3356_v39  ;;  %v3349_v31 = vrot.slane %v3344_v45, %v4771_v6  ;;  %v3398_v46 = vrot.slane %v3393_v30, %v4771_v6  ;;  %v2696_v54 = vrot.slane %v5524_v16, %v4780_v17 }
 0x207   : > { %v3881_v37 = vmul.bf16 %v5469_v57, %v3335_v22  ;;  %v3412_v61 = vrot.slane %v3407_v41, %v4771_v6  ;;  %v3391_v52 = vrot.slane %v3386_v51, %v4771_v6  ;;  %v3400_v0 = vpack.i.b16 %v2668_v34, %v2668_v34 }
 0x208   : > { %4028 = vmatprep.subr.bf16.mxu1 %v3884_v28  ;;  %v3883_v56 = vmul.bf16 %v5478_v11, %v3349_v31  ;;  %v3890_v15 = vmul.bf16 %v5472_v1, %v3398_v46  ;;  %v3449_v59 = vpack.i.b16 %v2696_v54, %v2696_v54  ;;  %v2704_v8 = vrot.slane %v5524_v16, %v4788_v21 }
 0x209   : > { %3986 = vmatpush1.bf16.msra.mxu0 %v3881_v37  ;;  %v3892_v42 = vmul.bf16 %v5480_v32, %v3412_v61  ;;  %v3889_v20 = vmul.bf16 %v5469_v57, %v3391_v52  ;;  %v3405_v9 = vrot.slane %v3400_v0, %v4771_v6  ;;  %v2692_v10 = vrot.slane %v5524_v16, %v4771_v6 }
 0x20a   : > { %4029 = vmatpush1.bf16.msra.mxu1 %v3883_v56  ;;  %3987 = vmatprep.subr.bf16.mxu0 %v3890_v15  ;;  %v3454_v7 = vrot.slane %v3449_v59, %v4771_v6  ;;  %v3463_v38 = vpack.i.b16 %v2704_v8, %v2704_v8  ;;  %v2700_v14 = vrot.slane %v5524_v16, %v4783_v18 }
 0x20b   : > { %4030 = vmatprep.subr.bf16.mxu1 %v3892_v42  ;;  %v3891_v23 = vmul.bf16 %v5478_v11, %v3405_v9  ;;  %v3442_v24 = vpack.i.b16 %v2692_v10, %v2692_v10  ;;  %v2728_v60 = vrot.slane %v5532_v4, %v4780_v17  ;;  %v2736_v25 = vrot.slane %v5532_v4, %v4788_v21 }
 0x20c   : > { %v3898_v53 = vmul.bf16 %v5472_v1, %v3454_v7  ;;  %v3468_v39 = vrot.slane %v3463_v38, %v4771_v6  ;;  %v3456_v45 = vpack.i.b16 %v2700_v14, %v2700_v14  ;;  %v2724_v30 = vrot.slane %v5532_v4, %v4771_v6 }
 0x20d   : > { %3988 = vmatpush1.bf16.msra.mxu0 %v3889_v20  ;;  %v3447_v22 = vrot.slane %v3442_v24, %v4771_v6  ;;  %v3505_v41 = vpack.i.b16 %v2728_v60, %v2728_v60  ;;  %v3519_v51 = vpack.i.b16 %v2736_v25, %v2736_v25  ;;  %v2732_v34 = vrot.slane %v5532_v4, %v4783_v18 }
 0x20e   : > { %4031 = vmatpush1.bf16.msra.mxu1 %v3891_v23  ;;  %3989 = vmatprep.subr.bf16.mxu0 %v3898_v53  ;;  %v3900_v28 = vmul.bf16 %v5480_v32, %v3468_v39  ;;  %v3461_v31 = vrot.slane %v3456_v45, %v4771_v6  ;;  %v3498_v46 = vpack.i.b16 %v2724_v30, %v2724_v30 }
 0x20f   : > { %v3897_v54 = vmul.bf16 %v5469_v57, %v3447_v22  ;;  %v3510_v37 = vrot.slane %v3505_v41, %v4771_v6  ;;  %v3524_v61 = vrot.slane %v3519_v51, %v4771_v6  ;;  %v3512_v52 = vpack.i.b16 %v2732_v34, %v2732_v34 }
 0x210   : > { %4032 = vmatprep.subr.bf16.mxu1 %v3900_v28  ;;  %v3899_v0 = vmul.bf16 %v5478_v11, %v3461_v31  ;;  %v3503_v56 = vrot.slane %v3498_v46, %v4771_v6  ;;  %v2760_v15 = vrot.slane %v5526_v58, %v4780_v17  ;;  %v2768_v59 = vrot.slane %v5526_v58, %v4788_v21 }
 0x211   : > { %3990 = vmatpush1.bf16.msra.mxu0 %v3897_v54  ;;  %v3906_v8 = vmul.bf16 %v5472_v1, %v3510_v37  ;;  %v3908_v42 = vmul.bf16 %v5480_v32, %v3524_v61  ;;  %v3517_v20 = vrot.slane %v3512_v52, %v4771_v6  ;;  %v2756_v9 = vrot.slane %v5526_v58, %v4771_v6 }
 0x212   : > { %4033 = vmatpush1.bf16.msra.mxu1 %v3899_v0  ;;  %v3905_v10 = vmul.bf16 %v5469_v57, %v3503_v56  ;;  %v3561_v7 = vpack.i.b16 %v2760_v15, %v2760_v15  ;;  %v3575_v38 = vpack.i.b16 %v2768_v59, %v2768_v59  ;;  %v2764_v14 = vrot.slane %v5526_v58, %v4783_v18 }
 0x213   : > { %3991 = vmatprep.subr.bf16.mxu0 %v3906_v8  ;;  %4034 = vmatprep.subr.bf16.mxu1 %v3908_v42  ;;  %v3907_v23 = vmul.bf16 %v5478_v11, %v3517_v20  ;;  %v3554_v24 = vpack.i.b16 %v2756_v9, %v2756_v9  ;;  %v2792_v60 = vrot.slane %v5534_v49, %v4780_v17 }
 0x214   : > { %v3566_v25 = vrot.slane %v3561_v7, %v4771_v6  ;;  %v3580_v53 = vrot.slane %v3575_v38, %v4771_v6  ;;  %v3568_v39 = vpack.i.b16 %v2764_v14, %v2764_v14  ;;  %v2800_v45 = vrot.slane %v5534_v49, %v4788_v21 }
 0x215   : > { %3992 = vmatpush1.bf16.msra.mxu0 %v3905_v10  ;;  %v3559_v30 = vrot.slane %v3554_v24, %v4771_v6  ;;  %v3617_v22 = vpack.i.b16 %v2792_v60, %v2792_v60  ;;  %v2788_v41 = vrot.slane %v5534_v49, %v4771_v6  ;;  %v2796_v51 = vrot.slane %v5534_v49, %v4783_v18 }
 0x216   : > { %4035 = vmatpush1.bf16.msra.mxu1 %v3907_v23  ;;  %v3914_v34 = vmul.bf16 %v5472_v1, %v3566_v25  ;;  %v3916_v28 = vmul.bf16 %v5480_v32, %v3580_v53  ;;  %v3573_v31 = vrot.slane %v3568_v39, %v4771_v6  ;;  %v3631_v46 = vpack.i.b16 %v2800_v45, %v2800_v45 }
 0x217   : > { %v3913_v54 = vmul.bf16 %v5469_v57, %v3559_v30  ;;  %v3622_v37 = vrot.slane %v3617_v22, %v4771_v6  ;;  %v3610_v61 = vpack.i.b16 %v2788_v41, %v2788_v41  ;;  %v3624_v52 = vpack.i.b16 %v2796_v51, %v2796_v51 }
 0x218   : > { %3993 = vmatprep.subr.bf16.mxu0 %v3914_v34  ;;  %4036 = vmatprep.subr.bf16.mxu1 %v3916_v28  ;;  %v3915_v0 = vmul.bf16 %v5478_v11, %v3573_v31  ;;  %v3636_v56 = vrot.slane %v3631_v46, %v4771_v6  ;;  %v2824_v15 = vrot.slane %v5528_v62, %v4780_v17 }
 0x219   : > { %3994 = vmatpush1.bf16.msra.mxu0 %v3913_v54  ;;  %v3922_v59 = vmul.bf16 %v5472_v1, %v3622_v37  ;;  %v3615_v8 = vrot.slane %v3610_v61, %v4771_v6  ;;  %v3629_v42 = vrot.slane %v3624_v52, %v4771_v6  ;;  %v2832_v20 = vrot.slane %v5528_v62, %v4788_v21 }
 0x21a   : > { %4037 = vmatpush1.bf16.msra.mxu1 %v3915_v0  ;;  %v3924_v9 = vmul.bf16 %v5480_v32, %v3636_v56  ;;  %v3673_v10 = vpack.i.b16 %v2824_v15, %v2824_v15  ;;  %v2820_v7 = vrot.slane %v5528_v62, %v4771_v6  ;;  %v2828_v38 = vrot.slane %v5528_v62, %v4783_v18 }
 0x21b   : > { %3995 = vmatprep.subr.bf16.mxu0 %v3922_v59  ;;  %v3921_v14 = vmul.bf16 %v5469_v57, %v3615_v8  ;;  %v3923_v23 = vmul.bf16 %v5478_v11, %v3629_v42  ;;  %v3687_v24 = vpack.i.b16 %v2832_v20, %v2832_v20  ;;  %v2856_v60 = vrot.slane %v5536_v50, %v4780_v17 }
 0x21c   : > { %4038 = vmatprep.subr.bf16.mxu1 %v3924_v9  ;;  %v3678_v25 = vrot.slane %v3673_v10, %v4771_v6  ;;  %v3666_v53 = vpack.i.b16 %v2820_v7, %v2820_v7  ;;  %v3680_v39 = vpack.i.b16 %v2828_v38, %v2828_v38  ;;  %v2864_v45 = vrot.slane %v5536_v50, %v4788_v21 }
 0x21d   : > { %3996 = vmatpush1.bf16.msra.mxu0 %v3921_v14  ;;  %v3692_v30 = vrot.slane %v3687_v24, %v4771_v6  ;;  %v3729_v22 = vpack.i.b16 %v2856_v60, %v2856_v60  ;;  %v2852_v41 = vrot.slane %v5536_v50, %v4771_v6  ;;  %v2860_v51 = vrot.slane %v5536_v50, %v4783_v18 }
 0x21e   : > { %4039 = vmatpush1.bf16.msra.mxu1 %v3923_v23  ;;  %v3930_v17 = vmul.bf16 %v5472_v1, %v3678_v25  ;;  %v3671_v34 = vrot.slane %v3666_v53, %v4771_v6  ;;  %v3685_v28 = vrot.slane %v3680_v39, %v4771_v6  ;;  %v3743_v31 = vpack.i.b16 %v2864_v45, %v2864_v45  ;;  %v5806_v25 = vld [vmem:[#allocation5] ss:$8 sps:$4 sm:$0xff]  }
 0x21f   : > { %v3932_v21 = vmul.bf16 %v5480_v32, %v3692_v30  ;;  %v3734_v46 = vrot.slane %v3729_v22, %v4771_v6  ;;  %v3722_v54 = vpack.i.b16 %v2852_v41, %v2852_v41  ;;  %v3736_v37 = vpack.i.b16 %v2860_v51, %v2860_v51 }
 0x220   : > { %3997 = vmatprep.subr.bf16.mxu0 %v3930_v17  ;;  %v3929_v61 = vmul.bf16 %v5469_v57, %v3671_v34  ;;  %v3931_v52 = vmul.bf16 %v5478_v11, %v3685_v28  ;;  %v3748_v18 = vrot.slane %v3743_v31, %v4771_v6  ;;  %v2392_v0 = vrot.slane %v5498_v40, %v4968_v26 }
 0x221   : > { %4040 = vmatprep.subr.bf16.mxu1 %v3932_v21  ;;  %v3938_v56 = vmul.bf16 %v5472_v1, %v3734_v46  ;;  %v3727_v15 = vrot.slane %v3722_v54, %v4771_v6  ;;  %v3741_v59 = vrot.slane %v3736_v37, %v4771_v6  ;;  %v2400_v8 = vrot.slane %v5498_v40, %v5157_v12 }
 0x222   : > { %3998 = vmatpush1.bf16.msra.mxu0 %v3929_v61  ;;  %4041 = vmatpush1.bf16.msra.mxu1 %v3931_v52  ;;  %v3940_v42 = vmul.bf16 %v5480_v32, %v3748_v18  ;;  %v2917_v20 = vpack.i.b16 %v2392_v0, %v2392_v0  ;;  %v2388_v9 = vrot.slane %v5498_v40, %v5109_v19 }
 0x223   : > { %3999 = vmatprep.subr.bf16.mxu0 %v3938_v56  ;;  %v3937_v10 = vmul.bf16 %v5469_v57, %v3727_v15  ;;  %v3939_v1 = vmul.bf16 %v5478_v11, %v3741_v59  ;;  %v2931_v7 = vpack.i.b16 %v2400_v8, %v2400_v8  ;;  %v2396_v38 = vrot.slane %v5498_v40, %v5119_v47 }
 0x224   : > { %4042 = vmatprep.subr.bf16.mxu1 %v3940_v42  ;;  %v2922_v14 = vrot.slane %v2917_v20, %v4771_v6  ;;  %v2910_v23 = vpack.i.b16 %v2388_v9, %v2388_v9  ;;  %v2424_v32 = vrot.slane %v5506_v44, %v4968_v26  ;;  %v2432_v24 = vrot.slane %v5506_v44, %v5157_v12 }
 0x225   : > { %v2936_v60 = vrot.slane %v2931_v7, %v4771_v6  ;;  %v2924_v57 = vpack.i.b16 %v2396_v38, %v2396_v38  ;;  %v2420_v11 = vrot.slane %v5506_v44, %v5109_v19  ;;  %v2428_v40 = vrot.slane %v5506_v44, %v5119_v47 }
 0x226   : > { %4000 = vmatpush1.bf16.msra.mxu0 %v3937_v10  ;;  %4043 = vmatpush1.bf16.msra.mxu1 %v3939_v1  ;;  %v3822_v53 = vmul.bf16 %v5490_v48, %v2922_v14  ;;  %v2915_v39 = vrot.slane %v2910_v23, %v4771_v6  ;;  %v2973_v45 = vpack.i.b16 %v2424_v32, %v2424_v32 }
 0x227   : > { %v3824_v30 = vmul.bf16 %v5496_v29, %v2936_v60  ;;  %v2929_v22 = vrot.slane %v2924_v57, %v4771_v6  ;;  %v2987_v41 = vpack.i.b16 %v2432_v24, %v2432_v24  ;;  %v2966_v51 = vpack.i.b16 %v2420_v11, %v2420_v11 }
 0x228   : > { %4055 = vmatprep.subr.bf16.mxu0 %v3822_v53  ;;  %v3821_v17 = vmul.bf16 %v5488_v13, %v2915_v39  ;;  %v2978_v34 = vrot.slane %v2973_v45, %v4771_v6  ;;  %v2980_v28 = vpack.i.b16 %v2428_v40, %v2428_v40  ;;  %v2456_v44 = vrot.slane %v5500_v33, %v4968_v26 }
 0x229   : > { %4098 = vmatprep.subr.bf16.mxu1 %v3824_v30  ;;  %4002 = vmatmul.mubr.bf16.vlgmr.msra.gmra.mrb[8].mxu0 %v5806_v25  ;;  %v3823_v31 = vmul.bf16 %v5494_v27, %v2929_v22  ;;  %v2992_v21 = vrot.slane %v2987_v41, %v4771_v6  ;;  %v2971_v46 = vrot.slane %v2966_v51, %v4771_v6 }
 0x22a   : > { %4045 = vmatmul.mubr.bf16.vlgmr.msra.gmra.mrb[8].mxu1 %v5806_v25  ;;  %4056 = vmatpush1.bf16.msra.mxu0 %v3821_v17  ;;  %v3830_v54 = vmul.bf16 %v5490_v48, %v2978_v34  ;;  %v2985_v37 = vrot.slane %v2980_v28, %v4771_v6  ;;  %v3029_v61 = vpack.i.b16 %v2456_v44, %v2456_v44 }
 0x22b   : > { %4099 = vmatpush1.bf16.msra.mxu1 %v3823_v31  ;;  %v3832_v52 = vmul.bf16 %v5496_v29, %v2992_v21  ;;  %v3829_v18 = vmul.bf16 %v5488_v13, %v2971_v46  ;;  %v2464_v0 = vrot.slane %v5500_v33, %v5157_v12  ;;  %v2452_v56 = vrot.slane %v5500_v33, %v5109_v19 }
 0x22c   : > { %4057 = vmatprep.subr.bf16.mxu0 %v3830_v54  ;;  %v3831_v15 = vmul.bf16 %v5494_v27, %v2985_v37  ;;  %v3034_v59 = vrot.slane %v3029_v61, %v4771_v6  ;;  %v2460_v8 = vrot.slane %v5500_v33, %v5119_v47  ;;  %v2488_v42 = vrot.slane %v5508_v35, %v4968_v26 }
 0x22d   : > { %4100 = vmatprep.subr.bf16.mxu1 %v3832_v52  ;;  %v3043_v20 = vpack.i.b16 %v2464_v0, %v2464_v0  ;;  %v3022_v9 = vpack.i.b16 %v2452_v56, %v2452_v56  ;;  %v2496_v10 = vrot.slane %v5508_v35, %v5157_v12  ;;  %v2484_v1 = vrot.slane %v5508_v35, %v5109_v19 }
 0x22e   : > { %4058 = vmatpush1.bf16.msra.mxu0 %v3829_v18  ;;  %v3838_v7 = vmul.bf16 %v5490_v48, %v3034_v59  ;;  %v3036_v38 = vpack.i.b16 %v2460_v8, %v2460_v8  ;;  %v3085_v14 = vpack.i.b16 %v2488_v42, %v2488_v42  ;;  %v2492_v33 = vrot.slane %v5508_v35, %v5119_v47 }
 0x22f   : > { %4101 = vmatpush1.bf16.msra.mxu1 %v3831_v15  ;;  %v3048_v23 = vrot.slane %v3043_v20, %v4771_v6  ;;  %v3027_v32 = vrot.slane %v3022_v9, %v4771_v6  ;;  %v3099_v24 = vpack.i.b16 %v2496_v10, %v2496_v10  ;;  %v3078_v60 = vpack.i.b16 %v2484_v1, %v2484_v1 }
 0x230   : > { %4059 = vmatprep.subr.bf16.mxu0 %v3838_v7  ;;  %v3041_v57 = vrot.slane %v3036_v38, %v4771_v6  ;;  %v3090_v11 = vrot.slane %v3085_v14, %v4771_v6  ;;  %v3092_v40 = vpack.i.b16 %v2492_v33, %v2492_v33  ;;  %v2520_v53 = vrot.slane %v5502_v3, %v4968_v26 }
 0x231   : > { %v3840_v39 = vmul.bf16 %v5496_v29, %v3048_v23  ;;  %v3837_v35 = vmul.bf16 %v5488_v13, %v3027_v32  ;;  %v3104_v45 = vrot.slane %v3099_v24, %v4771_v6  ;;  %v3083_v30 = vrot.slane %v3078_v60, %v4771_v6  ;;  %4087 = vmatprep.mubr.bf16.mxu0 %v5458_v2 }
 0x232   : > { %v3839_v22 = vmul.bf16 %v5494_v27, %v3041_v57  ;;  %v3846_v41 = vmul.bf16 %v5490_v48, %v3090_v11  ;;  %v3097_v51 = vrot.slane %v3092_v40, %v4771_v6  ;;  %v3141_v17 = vpack.i.b16 %v2520_v53, %v2520_v53  ;;  %4130 = vmatprep.mubr.bf16.mxu1 %v5458_v2 }
 0x233   : > { %4102 = vmatprep.subr.bf16.mxu1 %v3840_v39  ;;  %4060 = vmatpush1.bf16.msra.mxu0 %v3837_v35  ;;  %v3848_v34 = vmul.bf16 %v5496_v29, %v3104_v45  ;;  %v3845_v28 = vmul.bf16 %v5488_v13, %v3083_v30  ;;  %v2528_v44 = vrot.slane %v5502_v3, %v5157_v12 }
 0x234   : > { %4103 = vmatpush1.bf16.msra.mxu1 %v3839_v22  ;;  %4061 = vmatprep.subr.bf16.mxu0 %v3846_v41  ;;  %v3847_v31 = vmul.bf16 %v5494_v27, %v3097_v51  ;;  %v3146_v21 = vrot.slane %v3141_v17, %v4771_v6  ;;  %v2516_v46 = vrot.slane %v5502_v3, %v5109_v19 }
 0x235   : > { %4104 = vmatprep.subr.bf16.mxu1 %v3848_v34  ;;  %v3155_v2 = vpack.i.b16 %v2528_v44, %v2528_v44  ;;  %v2524_v54 = vrot.slane %v5502_v3, %v5119_v47  ;;  %v2552_v37 = vrot.slane %v5510_v5, %v4968_v26  ;;  %v2560_v61 = vrot.slane %v5510_v5, %v5157_v12 }
 0x236   : > { %v3854_v52 = vmul.bf16 %v5490_v48, %v3146_v21  ;;  %v3134_v18 = vpack.i.b16 %v2516_v46, %v2516_v46  ;;  %v2548_v0 = vrot.slane %v5510_v5, %v5109_v19  ;;  %v2556_v56 = vrot.slane %v5510_v5, %v5119_v47 }
 0x237   : > { %4062 = vmatpush1.bf16.msra.mxu0 %v3845_v28  ;;  %v3160_v15 = vrot.slane %v3155_v2, %v4771_v6  ;;  %v3148_v59 = vpack.i.b16 %v2524_v54, %v2524_v54  ;;  %v3197_v3 = vpack.i.b16 %v2552_v37, %v2552_v37  ;;  %v3211_v8 = vpack.i.b16 %v2560_v61, %v2560_v61 }
 0x238   : > { %4105 = vmatpush1.bf16.msra.mxu1 %v3847_v31  ;;  %4063 = vmatprep.subr.bf16.mxu0 %v3854_v52  ;;  %v3139_v42 = vrot.slane %v3134_v18, %v4771_v6  ;;  %v3190_v20 = vpack.i.b16 %v2548_v0, %v2548_v0  ;;  %v3204_v9 = vpack.i.b16 %v2556_v56, %v2556_v56 }
 0x239   : > { %v3856_v10 = vmul.bf16 %v5496_v29, %v3160_v15  ;;  %v3153_v1 = vrot.slane %v3148_v59, %v4771_v6  ;;  %v3202_v7 = vrot.slane %v3197_v3, %v4771_v6  ;;  %v3216_v5 = vrot.slane %v3211_v8, %v4771_v6 }
 0x23a   : > { %v3853_v38 = vmul.bf16 %v5488_v13, %v3139_v42  ;;  %v3195_v14 = vrot.slane %v3190_v20, %v4771_v6  ;;  %v3209_v33 = vrot.slane %v3204_v9, %v4771_v6  ;;  %v2584_v23 = vrot.slane %v5504_v36, %v4968_v26 }
 0x23b   : > { %4106 = vmatprep.subr.bf16.mxu1 %v3856_v10  ;;  %v3855_v32 = vmul.bf16 %v5494_v27, %v3153_v1  ;;  %v3862_v24 = vmul.bf16 %v5490_v48, %v3202_v7  ;;  %v3864_v60 = vmul.bf16 %v5496_v29, %v3216_v5  ;;  %v2592_v57 = vrot.slane %v5504_v36, %v5157_v12 }
 0x23c   : > { %4064 = vmatpush1.bf16.msra.mxu0 %v3853_v38  ;;  %v3861_v11 = vmul.bf16 %v5488_v13, %v3195_v14  ;;  %v3863_v40 = vmul.bf16 %v5494_v27, %v3209_v33  ;;  %v3253_v53 = vpack.i.b16 %v2584_v23, %v2584_v23  ;;  %v2580_v39 = vrot.slane %v5504_v36, %v5109_v19 }
 0x23d   : > { %4107 = vmatpush1.bf16.msra.mxu1 %v3855_v32  ;;  %4065 = vmatprep.subr.bf16.mxu0 %v3862_v24  ;;  %v3267_v35 = vpack.i.b16 %v2592_v57, %v2592_v57  ;;  %v2588_v45 = vrot.slane %v5504_v36, %v5119_v47  ;;  %v2616_v30 = vrot.slane %v5512_v43, %v4968_v26 }
 0x23e   : > { %4108 = vmatprep.subr.bf16.mxu1 %v3864_v60  ;;  %v3258_v22 = vrot.slane %v3253_v53, %v4771_v6  ;;  %v3246_v41 = vpack.i.b16 %v2580_v39, %v2580_v39  ;;  %v2624_v51 = vrot.slane %v5512_v43, %v5157_v12  ;;  %v2612_v17 = vrot.slane %v5512_v43, %v5109_v19 }
 0x23f   : > { %v3272_v34 = vrot.slane %v3267_v35, %v4771_v6  ;;  %v3260_v28 = vpack.i.b16 %v2588_v45, %v2588_v45  ;;  %v3309_v44 = vpack.i.b16 %v2616_v30, %v2616_v30  ;;  %v2620_v36 = vrot.slane %v5512_v43, %v5119_v47 }
 0x240   : > { %4066 = vmatpush1.bf16.msra.mxu0 %v3861_v11  ;;  %v3870_v31 = vmul.bf16 %v5490_v48, %v3258_v22  ;;  %v3251_v21 = vrot.slane %v3246_v41, %v4771_v6  ;;  %v3323_v46 = vpack.i.b16 %v2624_v51, %v2624_v51  ;;  %v3302_v2 = vpack.i.b16 %v2612_v17, %v2612_v17 }
 0x241   : > { %4109 = vmatpush1.bf16.msra.mxu1 %v3863_v40  ;;  %v3872_v54 = vmul.bf16 %v5496_v29, %v3272_v34  ;;  %v3265_v37 = vrot.slane %v3260_v28, %v4771_v6  ;;  %v3314_v61 = vrot.slane %v3309_v44, %v4771_v6  ;;  %v3316_v52 = vpack.i.b16 %v2620_v36, %v2620_v36 }
 0x242   : > { %4067 = vmatprep.subr.bf16.mxu0 %v3870_v31  ;;  %v3869_v18 = vmul.bf16 %v5488_v13, %v3251_v21  ;;  %v3328_v43 = vrot.slane %v3323_v46, %v4771_v6  ;;  %v3307_v0 = vrot.slane %v3302_v2, %v4771_v6  ;;  %v2648_v56 = vrot.slane %v5522_v55, %v4968_v26 }
 0x243   : > { %4110 = vmatprep.subr.bf16.mxu1 %v3872_v54  ;;  %v3871_v15 = vmul.bf16 %v5494_v27, %v3265_v37  ;;  %v3878_v59 = vmul.bf16 %v5490_v48, %v3314_v61  ;;  %v3321_v3 = vrot.slane %v3316_v52, %v4771_v6  ;;  %v2656_v8 = vrot.slane %v5522_v55, %v5157_v12 }
 0x244   : > { %4068 = vmatpush1.bf16.msra.mxu0 %v3869_v18  ;;  %v3880_v42 = vmul.bf16 %v5496_v29, %v3328_v43  ;;  %v3877_v20 = vmul.bf16 %v5488_v13, %v3307_v0  ;;  %v3365_v9 = vpack.i.b16 %v2648_v56, %v2648_v56  ;;  %v2644_v10 = vrot.slane %v5522_v55, %v5109_v19 }
 0x245   : > { %4111 = vmatpush1.bf16.msra.mxu1 %v3871_v15  ;;  %4069 = vmatprep.subr.bf16.mxu0 %v3878_v59  ;;  %v3879_v1 = vmul.bf16 %v5494_v27, %v3321_v3  ;;  %v3379_v7 = vpack.i.b16 %v2656_v8, %v2656_v8  ;;  %v2652_v5 = vrot.slane %v5522_v55, %v5119_v47 }
 0x246   : > { %4112 = vmatprep.subr.bf16.mxu1 %v3880_v42  ;;  %v3370_v38 = vrot.slane %v3365_v9, %v4771_v6  ;;  %v3358_v14 = vpack.i.b16 %v2644_v10, %v2644_v10  ;;  %v2680_v33 = vrot.slane %v5530_v63, %v4968_v26  ;;  %v2688_v23 = vrot.slane %v5530_v63, %v5157_v12 }
 0x247   : > { %v3384_v32 = vrot.slane %v3379_v7, %v4771_v6  ;;  %v3372_v24 = vpack.i.b16 %v2652_v5, %v2652_v5  ;;  %v2676_v60 = vrot.slane %v5530_v63, %v5109_v19  ;;  %v2684_v57 = vrot.slane %v5530_v63, %v5119_v47 }
 0x248   : > { %4070 = vmatpush1.bf16.msra.mxu0 %v3877_v20  ;;  %v3886_v55 = vmul.bf16 %v5490_v48, %v3370_v38  ;;  %v3363_v11 = vrot.slane %v3358_v14, %v4771_v6  ;;  %v3421_v40 = vpack.i.b16 %v2680_v33, %v2680_v33  ;;  %v3435_v53 = vpack.i.b16 %v2688_v23, %v2688_v23 }
 0x249   : > { %4113 = vmatpush1.bf16.msra.mxu1 %v3879_v1  ;;  %v3888_v39 = vmul.bf16 %v5496_v29, %v3384_v32  ;;  %v3377_v35 = vrot.slane %v3372_v24, %v4771_v6  ;;  %v3414_v45 = vpack.i.b16 %v2676_v60, %v2676_v60  ;;  %v3428_v30 = vpack.i.b16 %v2684_v57, %v2684_v57 }
 0x24a   : > { %4071 = vmatprep.subr.bf16.mxu0 %v3886_v55  ;;  %v3885_v22 = vmul.bf16 %v5488_v13, %v3363_v11  ;;  %v3426_v41 = vrot.slane %v3421_v40, %v4771_v6  ;;  %v3440_v63 = vrot.slane %v3435_v53, %v4771_v6  ;;  %v2712_v51 = vrot.slane %v5524_v16, %v4968_v26 }
 0x24b   : > { %4114 = vmatprep.subr.bf16.mxu1 %v3888_v39  ;;  %v3887_v17 = vmul.bf16 %v5494_v27, %v3377_v35  ;;  %v3419_v34 = vrot.slane %v3414_v45, %v4771_v6  ;;  %v3433_v28 = vrot.slane %v3428_v30, %v4771_v6  ;;  %v2720_v44 = vrot.slane %v5524_v16, %v5157_v12 }
 0x24c   : > { %4072 = vmatpush1.bf16.msra.mxu0 %v3885_v22  ;;  %v3894_v36 = vmul.bf16 %v5490_v48, %v3426_v41  ;;  %v3896_v31 = vmul.bf16 %v5496_v29, %v3440_v63  ;;  %v3477_v21 = vpack.i.b16 %v2712_v51, %v2712_v51  ;;  %v2708_v46 = vrot.slane %v5524_v16, %v5109_v19 }
 0x24d   : > { %4115 = vmatpush1.bf16.msra.mxu1 %v3887_v17  ;;  %v3893_v2 = vmul.bf16 %v5488_v13, %v3419_v34  ;;  %v3895_v54 = vmul.bf16 %v5494_v27, %v3433_v28  ;;  %v3491_v37 = vpack.i.b16 %v2720_v44, %v2720_v44  ;;  %v2716_v61 = vrot.slane %v5524_v16, %v5119_v47 }
 0x24e   : > { %4073 = vmatprep.subr.bf16.mxu0 %v3894_v36  ;;  %4116 = vmatprep.subr.bf16.mxu1 %v3896_v31  ;;  %v3482_v52 = vrot.slane %v3477_v21, %v4771_v6  ;;  %v3470_v18 = vpack.i.b16 %v2708_v46, %v2708_v46  ;;  %v2744_v43 = vrot.slane %v5532_v4, %v4968_v26 }
 0x24f   : > { %v3496_v0 = vrot.slane %v3491_v37, %v4771_v6  ;;  %v3484_v56 = vpack.i.b16 %v2716_v61, %v2716_v61  ;;  %v2752_v15 = vrot.slane %v5532_v4, %v5157_v12  ;;  %v2740_v59 = vrot.slane %v5532_v4, %v5109_v19 }
 0x250   : > { %4074 = vmatpush1.bf16.msra.mxu0 %v3893_v2  ;;  %v3902_v16 = vmul.bf16 %v5490_v48, %v3482_v52  ;;  %v3475_v3 = vrot.slane %v3470_v18, %v4771_v6  ;;  %v3533_v8 = vpack.i.b16 %v2744_v43, %v2744_v43  ;;  %v2748_v42 = vrot.slane %v5532_v4, %v5119_v47 }
 0x251   : > { %4117 = vmatpush1.bf16.msra.mxu1 %v3895_v54  ;;  %v3904_v20 = vmul.bf16 %v5496_v29, %v3496_v0  ;;  %v3489_v9 = vrot.slane %v3484_v56, %v4771_v6  ;;  %v3547_v10 = vpack.i.b16 %v2752_v15, %v2752_v15  ;;  %v3526_v1 = vpack.i.b16 %v2740_v59, %v2740_v59 }
 0x252   : > { %4075 = vmatprep.subr.bf16.mxu0 %v3902_v16  ;;  %v3901_v7 = vmul.bf16 %v5488_v13, %v3475_v3  ;;  %v3538_v5 = vrot.slane %v3533_v8, %v4771_v6  ;;  %v3540_v38 = vpack.i.b16 %v2748_v42, %v2748_v42  ;;  %v2776_v14 = vrot.slane %v5526_v58, %v4968_v26 }
 0x253   : > { %4118 = vmatprep.subr.bf16.mxu1 %v3904_v20  ;;  %v3903_v33 = vmul.bf16 %v5494_v27, %v3489_v9  ;;  %v3552_v4 = vrot.slane %v3547_v10, %v4771_v6  ;;  %v3531_v23 = vrot.slane %v3526_v1, %v4771_v6  ;;  %v2784_v32 = vrot.slane %v5526_v58, %v5157_v12 }
 0x254   : > { %4076 = vmatpush1.bf16.msra.mxu0 %v3901_v7  ;;  %v3910_v24 = vmul.bf16 %v5490_v48, %v3538_v5  ;;  %v3545_v60 = vrot.slane %v3540_v38, %v4771_v6  ;;  %v3589_v57 = vpack.i.b16 %v2776_v14, %v2776_v14  ;;  %v2772_v55 = vrot.slane %v5526_v58, %v5109_v19 }
 0x255   : > { %4119 = vmatpush1.bf16.msra.mxu1 %v3903_v33  ;;  %v3912_v11 = vmul.bf16 %v5496_v29, %v3552_v4  ;;  %v3909_v40 = vmul.bf16 %v5488_v13, %v3531_v23  ;;  %v3603_v53 = vpack.i.b16 %v2784_v32, %v2784_v32  ;;  %v2780_v39 = vrot.slane %v5526_v58, %v5119_v47 }
 0x256   : > { %4077 = vmatprep.subr.bf16.mxu0 %v3910_v24  ;;  %v3911_v35 = vmul.bf16 %v5494_v27, %v3545_v60  ;;  %v3594_v45 = vrot.slane %v3589_v57, %v4771_v6  ;;  %v3582_v30 = vpack.i.b16 %v2772_v55, %v2772_v55  ;;  %v2808_v22 = vrot.slane %v5534_v49, %v4968_v26 }
 0x257   : > { %4120 = vmatprep.subr.bf16.mxu1 %v3912_v11  ;;  %v3608_v41 = vrot.slane %v3603_v53, %v4771_v6  ;;  %v3596_v63 = vpack.i.b16 %v2780_v39, %v2780_v39  ;;  %v2816_v51 = vrot.slane %v5534_v49, %v5157_v12  ;;  %v2804_v17 = vrot.slane %v5534_v49, %v5109_v19 }
 0x258   : > { %4078 = vmatpush1.bf16.msra.mxu0 %v3909_v40  ;;  %v3918_v58 = vmul.bf16 %v5490_v48, %v3594_v45  ;;  %v3587_v34 = vrot.slane %v3582_v30, %v4771_v6  ;;  %v3645_v28 = vpack.i.b16 %v2808_v22, %v2808_v22  ;;  %v2812_v44 = vrot.slane %v5534_v49, %v5119_v47 }
 0x259   : > { %4121 = vmatpush1.bf16.msra.mxu1 %v3911_v35  ;;  %v3920_v36 = vmul.bf16 %v5496_v29, %v3608_v41  ;;  %v3601_v31 = vrot.slane %v3596_v63, %v4771_v6  ;;  %v3659_v21 = vpack.i.b16 %v2816_v51, %v2816_v51  ;;  %v3638_v46 = vpack.i.b16 %v2804_v17, %v2804_v17 }
 0x25a   : > { %4079 = vmatprep.subr.bf16.mxu0 %v3918_v58  ;;  %v3917_v2 = vmul.bf16 %v5488_v13, %v3587_v34  ;;  %v3650_v54 = vrot.slane %v3645_v28, %v4771_v6  ;;  %v3652_v37 = vpack.i.b16 %v2812_v44, %v2812_v44  ;;  %v2840_v61 = vrot.slane %v5528_v62, %v4968_v26 }
 0x25b   : > { %4122 = vmatprep.subr.bf16.mxu1 %v3920_v36  ;;  %v3919_v52 = vmul.bf16 %v5494_v27, %v3601_v31  ;;  %v3664_v49 = vrot.slane %v3659_v21, %v4771_v6  ;;  %v3643_v18 = vrot.slane %v3638_v46, %v4771_v6  ;;  %v2848_v43 = vrot.slane %v5528_v62, %v5157_v12 }
 0x25c   : > { %4080 = vmatpush1.bf16.msra.mxu0 %v3917_v2  ;;  %v3926_v0 = vmul.bf16 %v5490_v48, %v3650_v54  ;;  %v3657_v56 = vrot.slane %v3652_v37, %v4771_v6  ;;  %v3701_v15 = vpack.i.b16 %v2840_v61, %v2840_v61  ;;  %v2836_v59 = vrot.slane %v5528_v62, %v5109_v19 }
 0x25d   : > { %4123 = vmatpush1.bf16.msra.mxu1 %v3919_v52  ;;  %v3928_v16 = vmul.bf16 %v5496_v29, %v3664_v49  ;;  %v3925_v3 = vmul.bf16 %v5488_v13, %v3643_v18  ;;  %v3715_v8 = vpack.i.b16 %v2848_v43, %v2848_v43  ;;  %v2844_v42 = vrot.slane %v5528_v62, %v5119_v47 }
 0x25e   : > { %4081 = vmatprep.subr.bf16.mxu0 %v3926_v0  ;;  %v3927_v20 = vmul.bf16 %v5494_v27, %v3657_v56  ;;  %v3706_v9 = vrot.slane %v3701_v15, %v4771_v6  ;;  %v3694_v10 = vpack.i.b16 %v2836_v59, %v2836_v59  ;;  %v2872_v1 = vrot.slane %v5536_v50, %v4968_v26 }
 0x25f   : > { %4124 = vmatprep.subr.bf16.mxu1 %v3928_v16  ;;  %v3720_v7 = vrot.slane %v3715_v8, %v4771_v6  ;;  %v3708_v5 = vpack.i.b16 %v2844_v42, %v2844_v42  ;;  %v2880_v38 = vrot.slane %v5536_v50, %v5157_v12  ;;  %v2868_v14 = vrot.slane %v5536_v50, %v5109_v19 }
 0x260   : > { %4082 = vmatpush1.bf16.msra.mxu0 %v3925_v3  ;;  %v3934_v62 = vmul.bf16 %v5490_v48, %v3706_v9  ;;  %v3699_v33 = vrot.slane %v3694_v10, %v4771_v6  ;;  %v3757_v4 = vpack.i.b16 %v2872_v1, %v2872_v1  ;;  %v2876_v23 = vrot.slane %v5536_v50, %v5119_v47 }
 0x261   : > { %4125 = vmatpush1.bf16.msra.mxu1 %v3927_v20  ;;  %v3936_v26 = vmul.bf16 %v5496_v29, %v3720_v7  ;;  %v3713_v32 = vrot.slane %v3708_v5, %v4771_v6  ;;  %v3771_v24 = vpack.i.b16 %v2880_v38, %v2880_v38  ;;  %v3750_v60 = vpack.i.b16 %v2868_v14, %v2868_v14 }
 0x262   : > { %4083 = vmatprep.subr.bf16.mxu0 %v3934_v62  ;;  %v3933_v12 = vmul.bf16 %v5488_v13, %v3699_v33  ;;  %v3762_v19 = vrot.slane %v3757_v4, %v4771_v6  ;;  %v3764_v57 = vpack.i.b16 %v2876_v23, %v2876_v23 }
 0x263   : > { %4126 = vmatprep.subr.bf16.mxu1 %v3936_v26  ;;  %v3935_v55 = vmul.bf16 %v5494_v27, %v3713_v32  ;;  %v3776_v11 = vrot.slane %v3771_v24, %v4771_v6  ;;  %v3755_v47 = vrot.slane %v3750_v60, %v4771_v6 }
 0x264   : > { %4084 = vmatpush1.bf16.msra.mxu0 %v3933_v12  ;;  %v3942_v50 = vmul.bf16 %v5490_v48, %v3762_v19  ;;  %v3769_v40 = vrot.slane %v3764_v57, %v4771_v6 }
 0x265   : > { %4127 = vmatpush1.bf16.msra.mxu1 %v3935_v55  ;;  %v3944_v53 = vmul.bf16 %v5496_v29, %v3776_v11  ;;  %v3941_v39 = vmul.bf16 %v5488_v13, %v3755_v47 }
 0x266   : > { %4085 = vmatprep.subr.bf16.mxu0 %v3942_v50  ;;  %v3943_v35 = vmul.bf16 %v5494_v27, %v3769_v40 }
 0x267   : > { %4128 = vmatprep.subr.bf16.mxu1 %v3944_v53 }
 0x268   : > { %4086 = vmatpush1.bf16.msra.mxu0 %v3941_v39 }
 0x269   : > { %4129 = vmatpush1.bf16.msra.mxu1 %v3943_v35 }
 0x26b   : > { %4088 = vmatmul.mubr.bf16.vlgmr.msra.gmra.mrb[12].mxu0 %v5806_v25 }
 0x26c   : > { %4131 = vmatmul.mubr.bf16.vlgmr.msra.gmra.mrb[12].mxu1 %v5806_v25  ;;  %v3952_v45 = vpop.permute.xlu0 %3951 }
 0x273   : > { %v6057_v30 = vpop.permute.xlu0 %3956 }
 0x2fc   : > { %v4003_v48 = vpop.f32.mrb[8].mxu0 }
 0x2fd   : > { %v4004_v6 = vadd.f32 %v4003_v48, %v3952_v45  ;;  %v4046_v22 = vpop.f32.mrb[8].mxu1  ;;  %v4005_v29 = vpop.f32.mrb[9].mxu0 }
 0x2fe   : > { %v4047_v41 = vadd.f32 %v4046_v22, %v3952_v45  ;;  %v4006_v63 = vadd.f32 %v4005_v29, %v3952_v45  ;;  %v4048_v13 = vpop.f32.mrb[9].mxu1  ;;  %v4007_v51 = vpop.f32.mrb[10].mxu0 }
 0x2ff   : > { %vm4141_vm0 = vcmp.gt.f32.partialorder %v4004_v6, 0.0  ;;  %v4157_v27 = vmul.f32 0.1, %v4004_v6  ;;  %v4049_v17 = vadd.f32 %v4048_v13, %v3952_v45  ;;  %v4008_v58 = vadd.f32 %v4007_v51, %v6057_v30  ;;  %v4050_v34 = vpop.f32.mrb[10].mxu1  ;;  %v4009_v28 = vpop.f32.mrb[11].mxu0 }
 0x300   : > { %vm4143_vm1 = vcmp.gt.f32.partialorder %v4047_v41, 0.0  ;;  %v4159_v25 = vmul.f32 0.1, %v4047_v41  ;;  %vm4142_vm2 = vcmp.gt.f32.partialorder %v4006_v63, 0.0  ;;  %v4158_v44 = vmul.f32 0.1, %v4006_v63 }
 0x301   : > { %v4173_v36 = vsel %vm4141_vm0, %v4004_v6, %v4157_v27  ;;  %vm4144_vm3 = vcmp.gt.f32.partialorder %v4049_v17, 0.0  ;;  %v4160_v31 = vmul.f32 0.1, %v4049_v17  ;;  %vm4149_vm4 = vcmp.gt.f32.partialorder %v4008_v58, 0.0  ;;  %v4052_v21 = vpop.f32.mrb[11].mxu1 }
 0x302   : > { %4189 = vst [vmem:[%s6060_s13] sm:$0xff] %v4173_v36  ;;  %v4175_v46 = vsel %vm4143_vm1, %v4047_v41, %v4159_v25  ;;  %v4174_v2 = vsel %vm4142_vm2, %v4006_v63, %v4158_v44  ;;  %v4165_v54 = vmul.f32 0.1, %v4008_v58  ;;  %v4051_v37 = vadd.f32 %v4050_v34, %v6057_v30 }
 0x303   : > { %4191 = vst [vmem:[%s6060_s13 + $0x10] sm:$0xff] %v4175_v46  ;;  %4190 = vst [vmem:[%s6060_s13 + $0x8] sm:$0xff] %v4174_v2  ;;  %v4176_v61 = vsel %vm4144_vm3, %v4049_v17, %v4160_v31  ;;  %v4010_v52 = vadd.f32 %v4009_v28, %v6057_v30  ;;  %v4053_v49 = vadd.f32 %v4052_v21, %v6057_v30 }
 0x304   : > { %4192 = vst [vmem:[%s6060_s13 + $0x18] sm:$0xff] %v4176_v61  ;;  %v4181_v18 = vsel %vm4149_vm4, %v4008_v58, %v4165_v54  ;;  %vm4151_vm5 = vcmp.gt.f32.partialorder %v4051_v37, 0.0  ;;  %v4167_v43 = vmul.f32 0.1, %v4051_v37 }
 0x305   : > { %4197 = vst [vmem:[%s6060_s13 + $0x40] sm:$0xff] %v4181_v18  ;;  %vm4150_vm6 = vcmp.gt.f32.partialorder %v4010_v52, 0.0  ;;  %v4166_v0 = vmul.f32 0.1, %v4010_v52  ;;  %vm4152_vm7 = vcmp.gt.f32.partialorder %v4053_v49, 0.0 }
 0x306   : > { %v4168_v56 = vmul.f32 0.1, %v4053_v49  ;;  %v4183_v15 = vsel %vm4151_vm5, %v4051_v37, %v4167_v43 }
 0x307   : > { %4199 = vst [vmem:[%s6060_s13 + $0x50] sm:$0xff] %v4183_v15  ;;  %v4182_v59 = vsel %vm4150_vm6, %v4010_v52, %v4166_v0 }
 0x308   : > { %v4184_v16 = vsel %vm4152_vm7, %v4053_v49, %v4168_v56  ;;  %4198 = vst [vmem:[%s6060_s13 + $0x48] sm:$0xff] %v4182_v59 }
 0x309   : > { %4200 = vst [vmem:[%s6060_s13 + $0x58] sm:$0xff] %v4184_v16 }
 0x33e   : > { %v4089_v3 = vpop.f32.mrb[12].mxu0 }
 0x33f   : > { %v4090_v8 = vadd.f32 %v4089_v3, %v3952_v45  ;;  %v4132_v42 = vpop.f32.mrb[12].mxu1  ;;  %v4091_v20 = vpop.f32.mrb[13].mxu0 }
 0x340   : > { %v4133_v9 = vadd.f32 %v4132_v42, %v3952_v45  ;;  %v4092_v10 = vadd.f32 %v4091_v20, %v3952_v45  ;;  %v4134_v1 = vpop.f32.mrb[13].mxu1  ;;  %v4093_v7 = vpop.f32.mrb[14].mxu0 }
 0x341   : > { %vm4145_vm8 = vcmp.gt.f32.partialorder %v4090_v8, 0.0  ;;  %v4161_v5 = vmul.f32 0.1, %v4090_v8  ;;  %v4135_v38 = vadd.f32 %v4134_v1, %v3952_v45  ;;  %v4094_v14 = vadd.f32 %v4093_v7, %v6057_v30  ;;  %v4136_v62 = vpop.f32.mrb[14].mxu1  ;;  %v4095_v33 = vpop.f32.mrb[15].mxu0 }
 0x342   : > { %vm4147_vm9 = vcmp.gt.f32.partialorder %v4133_v9, 0.0  ;;  %v4163_v4 = vmul.f32 0.1, %v4133_v9  ;;  %vm4146_vm10 = vcmp.gt.f32.partialorder %v4092_v10, 0.0  ;;  %v4162_v23 = vmul.f32 0.1, %v4092_v10 }
 0x343   : > { %v4177_v26 = vsel %vm4145_vm8, %v4090_v8, %v4161_v5  ;;  %vm4148_vm11 = vcmp.gt.f32.partialorder %v4135_v38, 0.0  ;;  %v4164_v32 = vmul.f32 0.1, %v4135_v38  ;;  %vm4153_vm12 = vcmp.gt.f32.partialorder %v4094_v14, 0.0  ;;  %v4138_v24 = vpop.f32.mrb[15].mxu1 }
 0x344   : > { %4193 = vst [vmem:[%s6060_s13 + $0x20] sm:$0xff] %v4177_v26  ;;  %v4179_v60 = vsel %vm4147_vm9, %v4133_v9, %v4163_v4  ;;  %v4178_v12 = vsel %vm4146_vm10, %v4092_v10, %v4162_v23  ;;  %v4169_v19 = vmul.f32 0.1, %v4094_v14  ;;  %v4137_v57 = vadd.f32 %v4136_v62, %v6057_v30 }
 0x345   : > { %4195 = vst [vmem:[%s6060_s13 + $0x30] sm:$0xff] %v4179_v60  ;;  %4194 = vst [vmem:[%s6060_s13 + $0x28] sm:$0xff] %v4178_v12  ;;  %v4180_v55 = vsel %vm4148_vm11, %v4135_v38, %v4164_v32  ;;  %v4096_v11 = vadd.f32 %v4095_v33, %v6057_v30  ;;  %v4139_v47 = vadd.f32 %v4138_v24, %v6057_v30 }
 0x346   : > { %4196 = vst [vmem:[%s6060_s13 + $0x38] sm:$0xff] %v4180_v55  ;;  %v4185_v50 = vsel %vm4153_vm12, %v4094_v14, %v4169_v19  ;;  %vm4155_vm13 = vcmp.gt.f32.partialorder %v4137_v57, 0.0  ;;  %v4171_v40 = vmul.f32 0.1, %v4137_v57 }
 0x347   : > { %4201 = vst [vmem:[%s6060_s13 + $0x60] sm:$0xff] %v4185_v50  ;;  %vm4154_vm14 = vcmp.gt.f32.partialorder %v4096_v11, 0.0  ;;  %v4170_v53 = vmul.f32 0.1, %v4096_v11  ;;  %vm4156_vm15 = vcmp.gt.f32.partialorder %v4139_v47, 0.0 }
 0x348   : > { %v4172_v39 = vmul.f32 0.1, %v4139_v47  ;;  %v4187_v35 = vsel %vm4155_vm13, %v4137_v57, %v4171_v40 }
 0x349   : > { %4203 = vst [vmem:[%s6060_s13 + $0x70] sm:$0xff] %v4187_v35  ;;  %v4186_v45 = vsel %vm4154_vm14, %v4096_v11, %v4170_v53 }
 0x34a   : > { %v4188_v48 = vsel %vm4156_vm15, %v4139_v47, %v4172_v39  ;;  %4202 = vst [vmem:[%s6060_s13 + $0x68] sm:$0xff] %v4186_v45 }
 0x34b   : > { %4204 = vst [vmem:[%s6060_s13 + $0x78] sm:$0xff] %v4188_v48 }
 0x34c   : > { %4517 = shalt.err (!%p4514_p11)
}
 0x34d   : > { %s4518_s14 = scalar_lea.hbm %s6087_s30, 2048  ;;  %s4522_s7 = scalar_lea.hbm %s6139_s4, 6144 }
 0x34e   : > { %p4519_p13 = scmp.ne.s32.totalorder %s6087_s30, %s4518_s14  ;;  %p4523_p12 = scmp.lt.u32.totalorder %s6087_s30, %s6139_s4 }
 0x34f   : > { %p4524_p4 = scmp.lt.u32.totalorder %s4522_s7, %s4518_s14  ;;  %p4526_p7 = scmp.lt.u32.totalorder %s4518_s14, %s6087_s30 }
 0x350   : > { %p4520_p2 = pnand %p4519_p13, %p6157_p9 }
 0x351   : > { %p4525_p0 = por %p4524_p4, %p4523_p12 }
 0x352   : > { %p4521_p6 = pneg %p4520_p2 }
 0x353   : > { %p4527_p10 = por %p4526_p7, %p4525_p0 }
 0x355   : > { %p4528_p1 = pnand %p4527_p10, %p4521_p6 }
 0x357   : > { %4531 = shalt.err (!%p4528_p1)
}
 0x358   : > { %s4586_s13 = smov 1024   ;;  %s4587_s5 = smov 3072  }
 0x359   : > { %s4588_s19 = smov 64  }
 0x35a   : > { %4378 = dma.vmem_to_hbm [thread:$0]  (%p6157_p9), %s6089_s20, 2048, %s6087_s30, %s4206_s8, %s4586_s13, %s4587_s5, %s4588_s19  }
 0x35b PF: > { %p4395_p3 = scmp.ge.s32.totalorder %s4574_s18, 2  ;;  %s4234_s22 = sand.u32 1, %s4562_s15  }
 0x35c   : > { %p6158_p8 = scmp.ne.s32.totalorder %s6147_s28, 0  ;;  %s4235_s11 = scalar_lea.sflag [#allocation4], %s4234_s22 }
 0x35e   : > { %p4389_p5 = pnand %p4395_p3, %p6158_p8 }
 0x360   : > { %4557 = dma.done.wait (!%p4389_p5), %s4235_s11, 2048  }
 0x361   : > { %4559 = vsyncadd (!%p4389_p5), %s4235_s11, 4294965248  ;;  %p18_p11 = scmp.ge.s32.totalorder %s4639_s21, 5   ;;  %s6159_s15 = smov %s4566_s16 }
 0x362   : > { %s6160_s16 = smov %s4570_s17  ;;  %s6161_s17 = smov %s4651_s24 }
 0x363   : > { %s6162_s18 = smov %s4639_s21  ;;  %20 = sbr.rel (!%p18_p11) target bundleno = 6 (0x6), region = 85 }
 0x36a   :  { %4240 = vsyncpa [#allocation3], 1 }
 0x36b   :  { %4242 = vsyncpa [#allocation3 + $0x1], 1 }
 0x36c   :  { %4243 = vsyncpa [#allocation6], 1 }
 0x36d   :  { %4244 = vsyncpa [#allocation4], 1 }
 0x36e   :  { %4246 = vsyncpa [#allocation4 + $0x1], 1 }

</bundles_post_ra>
